<compile_context>
chip_gen: v6e
topology: v6e:2x2x1
jax: 0.10.0
libtpu: 0.0.40
codegen_flags: <defaults>
</compile_context>

<pallas_src>
import jax
import jax.numpy as jnp
from jax.experimental import pallas as pl
from jax.experimental.pallas import tpu as pltpu


def _round_up(x, m):
    return ((x + m - 1) // m) * m


def _choose_tb(B, D, itemsize):
    # ~1 MiB per input per grid step: per measured tiling data this reaches ~85% of the HBM
    # roofline, vs ~60% at 256 KiB tiles (the old TB=512/D=128 case).
    target = max(128, _round_up((1 << 20) // (D * itemsize), 128))
    # VMEM cap: 3 inputs x 2 pipeline buffers must stay under ~12 MiB (v5e default scoped = 16 MiB).
    vmem_cap = max(128, (((12 << 20) // (6 * D * itemsize)) // 128) * 128)
    # Keep >=~4 grid steps (>=2 per TensorCore with "parallel" on v7x) so each core still has a
    # pipeline to overlap; also handles small batches (single lane-dense 128-row tile).
    four_way = max(128, _round_up(pl.cdiv(B, 4), 128))
    return min(target, vmem_cap, four_way)


def _classifier_kernel(a_ref, p_ref, n_ref, w_ref, b_ref, o_ref):
    # (TB, D) tiles; f32 accumulation on the VPU. No concat (cross-lane relayout + extra VMEM
    # buffer) and no N=1 MXU matmul. Inputs may be bf16/f16; upcast here, accumulate in f32.
    a = a_ref[...].astype(jnp.float32)
    p = p_ref[...].astype(jnp.float32)
    n = n_ref[...].astype(jnp.float32)
    w = w_ref[...]                                        # (3, D) f32, constant index -> VMEM-resident
    s = a * w[0:1, :] + p * w[1:2, :] + n * w[2:3, :]     # VPU multiply-accumulate
    # XLU lane reduction + SMEM scalar bias.
    # TODO(synk): on v7x (3.2 TB/s HBM) with small D, if bundle dumps show the XLU reduce as the
    # binding slot, offload it to the idle MXU (e.g. s @ ones((D, 1))) and keep VPU+XLU on v5e/v6e.
    y = jnp.sum(s, axis=-1) + b_ref[0, 0]
    # Lane-dense store: one (1, TB) row (TB multiple of 128 -> unmasked vst, except the tail block).
    o_ref[...] = y[None, :].astype(o_ref.dtype)


def simple_classifier_forward(anchor, positive, negative, weight, bias):
    """anchor/positive/negative: (B, D); weight: (1, 3*D) (torch Linear layout); bias: (1,).

    Returns (B,) float32, matching SimpleClassifier.forward.
    """
    B, D = anchor.shape
    assert weight.shape == (1, 3 * D)

    # torch weight (1, 3D) -> (3, D) rows in concat order (a, p, n); cast to f32 once here.
    w3 = jnp.asarray(weight, jnp.float32).reshape(3, D)
    b2 = jnp.asarray(bias, jnp.float32).reshape(1, 1)

    itemsize = jnp.dtype(anchor.dtype).itemsize
    TB = _choose_tb(B, D, itemsize)
    grid = (pl.cdiv(B, TB),)  # no padding: tail block's OOB rows compute garbage that is
                              # never written (Pallas masks the partial output block).

    out = pl.pallas_call(
        _classifier_kernel,
        out_shape=jax.ShapeDtypeStruct((1, B), jnp.float32),
        grid=grid,
        in_specs=[
            pl.BlockSpec((TB, D), lambda i: (i, 0)),
            pl.BlockSpec((TB, D), lambda i: (i, 0)),
            pl.BlockSpec((TB, D), lambda i: (i, 0)),
            pl.BlockSpec((3, D), lambda i: (0, 0)),             # merged weights, VMEM-resident
            pl.BlockSpec(memory_space=pltpu.MemorySpace.SMEM),  # bias scalar in SMEM
        ],
        out_specs=pl.BlockSpec((1, TB), lambda i: (0, i)),
        compiler_params=pltpu.CompilerParams(
            dimension_semantics=("parallel",),  # batch tiles shard across TCs on v7x
        ),
    )(anchor, positive, negative, w3, b2)

    return out[0]


def init_params(key, input_dim):
    """Deterministic init mimicking nn.Linear(input_dim*3, 1) default init (torch layout)."""
    fan_in = input_dim * 3
    bound = 1.0 / jnp.sqrt(jnp.float32(fan_in))
    kw, kb = jax.random.split(key)
    weight = jax.random.uniform(kw, (1, fan_in), jnp.float32, -bound, bound)
    bias = jax.random.uniform(kb, (1,), jnp.float32, -bound, bound)
    return weight, bias


if __name__ == "__main__":
    key = jax.random.PRNGKey(0)
    k_a, k_p, k_n, k_w = jax.random.split(key, 4)

    # Exercises batch tiling (TB=256, grid=(4,)) and the no-pad partial tail block (1000 % 256).
    B, D = 1000, 128
    anchor = jax.random.normal(k_a, (B, D), jnp.float32)
    positive = jax.random.normal(k_p, (B, D), jnp.float32)
    negative = jax.random.normal(k_n, (B, D), jnp.float32)

    weight, bias = init_params(k_w, D)

    out = simple_classifier_forward(anchor, positive, negative, weight, bias)
    out = jax.block_until_ready(out)

    # Pure-JAX reference (same math as torch forward: cat -> Linear -> squeeze(-1)).
    x = jnp.concatenate([anchor, positive, negative], axis=1)
    ref = jnp.sum(x * weight, axis=1) + bias[0]
    assert out.shape == (B,)
    assert jnp.allclose(out, ref, atol=1e-4, rtol=1e-4), float(jnp.max(jnp.abs(out - ref)))

    print("KERNEL_OK")
</pallas_src>

<mosaic_0001>
module attributes {stable_mosaic.version = 11 : i64} {
  func.func @_classifier_kernel(%arg0: i32, %arg1: memref<256x128xf32, #tpu.memory_space<vmem>>, %arg2: memref<256x128xf32, #tpu.memory_space<vmem>>, %arg3: memref<256x128xf32, #tpu.memory_space<vmem>>, %arg4: memref<3x128xf32, #tpu.memory_space<vmem>>, %arg5: memref<1x1xf32, #tpu.memory_space<smem>>, %arg6: memref<1x256xf32, #tpu.memory_space<vmem>>) attributes {dimension_semantics = [#tpu.dimension_semantics<parallel>], iteration_bounds = array<i64: 4>, scalar_prefetch = 0 : i64, scratch_operands = 0 : i64, tpu.core_type = #tpu.core_type<tc>, window_params = [{transform_indices = @transform_0, window_bounds = array<i64: 256, 128>}, {transform_indices = @transform_1, window_bounds = array<i64: 256, 128>}, {transform_indices = @transform_2, window_bounds = array<i64: 256, 128>}, {pipeline_mode = #tpu.pipeline_mode<synchronous>, transform_indices = @transform_3, window_bounds = array<i64: 3, 128>}, {transform_indices = @transform_4, window_bounds = array<i64: 1, 1>}, {transform_indices = @transform_5, window_bounds = array<i64: 1, 256>}]} {
    %c0 = arith.constant 0 : index
    %c0_0 = arith.constant 0 : index
    %0 = vector.load %arg1[%c0, %c0_0] : memref<256x128xf32, #tpu.memory_space<vmem>>, vector<256x128xf32>
    %c0_1 = arith.constant 0 : index
    %c0_2 = arith.constant 0 : index
    %1 = vector.load %arg2[%c0_1, %c0_2] : memref<256x128xf32, #tpu.memory_space<vmem>>, vector<256x128xf32>
    %c0_3 = arith.constant 0 : index
    %c0_4 = arith.constant 0 : index
    %2 = vector.load %arg3[%c0_3, %c0_4] : memref<256x128xf32, #tpu.memory_space<vmem>>, vector<256x128xf32>
    %c0_5 = arith.constant 0 : index
    %c0_6 = arith.constant 0 : index
    %3 = vector.load %arg4[%c0_5, %c0_6] : memref<3x128xf32, #tpu.memory_space<vmem>>, vector<3x128xf32>
    %4 = vector.extract_strided_slice %3 {offsets = [0, 0], sizes = [1, 128], strides = [1, 1]} : vector<3x128xf32> to vector<1x128xf32>
    %5 = vector.broadcast %4 : vector<1x128xf32> to vector<256x128xf32>
    %6 = arith.mulf %0, %5 : vector<256x128xf32>
    %7 = vector.extract_strided_slice %3 {offsets = [1, 0], sizes = [1, 128], strides = [1, 1]} : vector<3x128xf32> to vector<1x128xf32>
    %8 = vector.broadcast %7 : vector<1x128xf32> to vector<256x128xf32>
    %9 = arith.mulf %1, %8 : vector<256x128xf32>
    %10 = arith.addf %6, %9 : vector<256x128xf32>
    %11 = vector.extract_strided_slice %3 {offsets = [2, 0], sizes = [1, 128], strides = [1, 1]} : vector<3x128xf32> to vector<1x128xf32>
    %12 = vector.broadcast %11 : vector<1x128xf32> to vector<256x128xf32>
    %13 = arith.mulf %2, %12 : vector<256x128xf32>
    %14 = arith.addf %10, %13 : vector<256x128xf32>
    %cst = arith.constant dense<0.000000e+00> : vector<256xf32>
    %15 = vector.multi_reduction <add>, %14, %cst [1] : vector<256x128xf32> to vector<256xf32>
    %c0_7 = arith.constant 0 : index
    %c0_8 = arith.constant 0 : index
    %16 = memref.load %arg5[%c0_7, %c0_8] : memref<1x1xf32, #tpu.memory_space<smem>>
    %17 = vector.broadcast %16 : f32 to vector<256xf32>
    %18 = arith.addf %15, %17 : vector<256xf32>
    %19 = vector.shape_cast %18 : vector<256xf32> to vector<1x256xf32>
    %c0_9 = arith.constant 0 : index
    %c0_10 = arith.constant 0 : index
    %20 = vector.load %arg6[%c0_9, %c0_10] : memref<1x256xf32, #tpu.memory_space<vmem>>, vector<1x256xf32>
    tpu.vector_store %arg6[%c0_9, %c0_10], %19 {strides = array<i32>} : memref<1x256xf32, #tpu.memory_space<vmem>>, vector<1x256xf32>,
    return
  }
  func.func @transform_0(%arg0: i32) -> (i32, i32) {
    %c0_i32 = arith.constant 0 : i32
    %c0_i32_0 = arith.constant 0 : i32
    return %arg0, %c0_i32 : i32, i32
  }
  func.func @transform_1(%arg0: i32) -> (i32, i32) {
    %c0_i32 = arith.constant 0 : i32
    %c0_i32_0 = arith.constant 0 : i32
    return %arg0, %c0_i32 : i32, i32
  }
  func.func @transform_2(%arg0: i32) -> (i32, i32) {
    %c0_i32 = arith.constant 0 : i32
    %c0_i32_0 = arith.constant 0 : i32
    return %arg0, %c0_i32 : i32, i32
  }
  func.func @transform_3(%arg0: i32) -> (i32, i32) {
    %c0_i32 = arith.constant 0 : i32
    %c0_i32_0 = arith.constant 0 : i32
    %c0_i32_1 = arith.constant 0 : i32
    return %c0_i32, %c0_i32_0 : i32, i32
  }
  func.func @transform_4(%arg0: i32) -> (i32, i32) {
    %c0_i32 = arith.constant 0 : i32
    %c0_i32_0 = arith.constant 0 : i32
    %c0_i32_1 = arith.constant 0 : i32
    return %c0_i32, %c0_i32_0 : i32, i32
  }
  func.func @transform_5(%arg0: i32) -> (i32, i32) {
    %c0_i32 = arith.constant 0 : i32
    %c0_i32_0 = arith.constant 0 : i32
    return %c0_i32, %arg0 : i32, i32
  }
}

</mosaic_0001>

<bundles_post_ra>
// kernel: tpu_custom_call.1
= control target key start
LH: loop header
LB: loop body
LE: loop exit
PB: predicated region body
PF: predicated region fallthrough
CT: control target
= control target key end

     0   :  { %s5441_s0 = inlined_call_operand.hbm [shape: f32[1000,128], index: 0, kind: input, shape index: {}]   ;;  %s5442_s1 = inlined_call_operand.hbm [shape: f32[1000,128], index: 1, kind: input, shape index: {}]   ;;  %s5443_s2 = inlined_call_operand.hbm [shape: f32[1000,128], index: 2, kind: input, shape index: {}]   ;;  %s5444_s3 = inlined_call_operand.vmem [shape: f32[3,128], index: 3, kind: input, shape index: {}]   ;;  %s5445_s4 = inlined_call_operand.<no memory space> [shape: f32[1,1], index: 4, kind: input, shape index: {}]   ;;  %s5446_s5 = inlined_call_operand.hbm [shape: f32[1,1000], index: 5, kind: output, shape index: {}]  }
   0x1   :  { %10 = sst [smem:[#allocation2]] %s5445_s4 }
   0x2   :  { %11 = vsyncpa [#allocation4], 0 }
   0x3   :  { %13 = vsyncpa [#allocation4 + $0x1], 0 }
   0x4   :  { %14 = vsyncpa [#allocation7], 0 }
   0x5   :  { %16 = vsyncpa [#allocation7 + $0x1], 0 }
   0x6   :  { %17 = vsyncpa [#allocation5], 0 }
   0x7   :  { %19 = vsyncpa [#allocation5 + $0x1], 0  ;;  %s4064_s20 = smov 0   ;;  %s4066_s21 = smov 0  }
   0x8   :  { %s4068_s22 = smov 0   ;;  %s4070_s23 = smov 0  }
   0x9 LB: > { %s4085_s4 = sadd.s32 4294967295, %s4017_s23   ;;  %s3781_s24 = sadd.s32 4294967294, %s4017_s23   ;;  %s4017_s23 = sphi %s4070_s23, %s5457_s23   ;;  %s4013_s22 = sphi %s4068_s22, %s5456_s22   ;;  %s4009_s21 = sphi %s4066_s21, %s5455_s21   ;;  %s4005_s20 = sphi %s4064_s20, %s5454_s20  }
   0xa   : > { %s4089_s25 = sadd.s32 1, %s4017_s23   ;;  %s32_s26 = sadd.s32 1, %s4013_s22 }
   0xb   : > { %s29_s27 = ssub.s32 %s4017_s23, %s4089_s25  ;;  %p39_p0 = scmp.ne.s32.totalorder %s4013_s22, %s4009_s21 }
   0xc   : > { %p30_p1 = scmp.eq.s32.totalorder %s29_s27, 0  ;;  %p40_p2 = scmp.eq.s32.totalorder %s4017_s23, 0 }
   0xd   : > { %p45_p3 = scmp.ne.s32.totalorder %s4009_s21, %s4005_s20  ;;  %p46_p4 = scmp.eq.s32.totalorder %s4085_s4, 0 }
   0xe   : > { %s4101_s28 = scalar_select %p30_p1, %s4013_s22, %s32_s26  }
   0xf   : > { %p4103_p5 = por %p40_p2, %p39_p0  ;;  %p4107_p6 = por %p46_p4, %p45_p3 }
  0x10   : > { %p163_p7 = scmp.eq.s32.totalorder %s4085_s4, 3  ;;  %p169_p8 = scmp.eq.s32.totalorder %s3781_s24, 3 }
  0x11   : > { %p3783_p11 = scmp.ge.s32.totalorder %s4017_s23, 4 }
  0x12   : > { %p4112_p9 = por %p163_p7, %p39_p0  ;;  %p4116_p10 = por %p169_p8, %p45_p3 }
  0x13   : > { %191 = sbr.rel (%p3783_p11) target bundleno = 120 (0x78), region = 24 }
  0x14   : > { %s5450_s6 = scalar_select %p4112_p9, 1, 0 }
  0x15   : > { %s5451_s7 = scalar_select %p4116_p10, 1, 0 }
  0x18   : > { %194 = sbr.rel (!%p4103_p5) target bundleno = 56 (0x38), region = 28  ;;  %s195_s8 = sand.u32 (%p4103_p5), 1, %s4013_s22  }
  0x19   : > { %s3785_s9 = sshll.u32 (%p4103_p5), %s4017_s23, 5  ;;  %s3784_s10 = sshll.u32 (%p4103_p5), %s195_s8, 8 }
  0x1a   : > { %s201_s11 = ssub.s32 (%p4103_p5), 125, %s3785_s9  ;;  %s4128_s14 = scalar_lea.sflag (%p4103_p5), [#allocation4], %s195_s8 }
  0x1b   : > { %p202_p12 = scmp.lt.s32.totalorder (%p4103_p5), %s201_s11, 32  ;;  %s199_s15 = scalar_lea.vmem (%p4103_p5), [#allocation3], %s3784_s10 }
  0x1d   : > { %s5459_s11 = smov (!%p202_p12, %s201_s11), 32 }
  0x1e   : > { %s4125_s12 = sshll.u32 %s5459_s11, 7 }
  0x1f   : > { %s206_s13 = ssub.s32 4096, %s4125_s12 }
  0x20   : > { %207 = vsyncadd %s4128_s14, %s206_s13  ;;  %p3787_p13 = scmp.ne.s32.totalorder %s4125_s12, 0  ;;  %s3815_s16 = sshll.u32 %s4017_s23, 12 }
  0x21   : > { %s4136_s19 = scalar_lea.hbm %s5441_s0, %s3815_s16  ;;  %s212_s24 = sshll.u32 %s199_s15, 4  ;;  %s4138_s24 = int_to_ptr.vmem [resolvable:$true] %s212_s24 }
  0x22   : > { %s3871_s26 = scalar_lea.hbm %s4136_s19, %s4125_s12  ;;  %s3875_s9 = scalar_lea.hbm %s5441_s0, 16000 }
  0x23   : > { %p3872_p0 = scmp.ne.s32.totalorder %s4136_s19, %s3871_s26  ;;  %p3876_p3 = scmp.lt.s32.totalorder %s4136_s19, %s5441_s0 }
  0x24   : > { %p3877_p4 = scmp.lt.s32.totalorder %s3875_s9, %s3871_s26 }
  0x25   : > { %p3873_p1 = pnand %p3872_p0, %p3787_p13 }
  0x26   : > { %p3878_p7 = por %p3877_p4, %p3876_p3 }
  0x27   : > { %p3874_p2 = pneg %p3873_p1 }
  0x29   : > { %p3879_p8 = pnand %p3878_p7, %p3874_p2 }
  0x2b   : > { %3882 = shalt.err (!%p3879_p8)
}
  0x2c   : > { %s3883_s13 = scalar_lea.vmem %s4138_s24, %s4125_s12  ;;  %s4019_s15 = smov [#allocation3]  }
  0x2d   : > { %p3884_p11 = scmp.ne.s32.totalorder %s4138_s24, %s3883_s13  ;;  %s3887_s16 = sshll.u32 %s4019_s15, 4  ;;  %s3888_s16 = int_to_ptr.vmem [resolvable:$false] %s3887_s16 }
  0x2e   : > { %s3889_s17 = scalar_lea.vmem %s3888_s16, 8192  ;;  %p3890_p1 = scmp.lt.s32.totalorder %s4138_s24, %s3888_s16 }
  0x2f   : > { %p3885_p12 = pnand %p3884_p11, %p3787_p13  ;;  %p3891_p10 = scmp.lt.s32.totalorder %s3889_s17, %s3883_s13 }
  0x31   : > { %p3886_p0 = pneg %p3885_p12  ;;  %p3892_p9 = por %p3891_p10, %p3890_p1 }
  0x33   : > { %p3893_p3 = pnand %p3892_p9, %p3886_p0 }
  0x35   : > { %3896 = shalt.err (!%p3893_p3)
}
  0x36   : > { %s4020_s18 = smov 128   ;;  %s4021_s26 = smov 8  }
  0x37   : > { %218 = dma.hbm_to_vmem [thread:$0]  (%p3787_p13), %s4136_s19, %s4125_s12, %s4138_s24, %s4128_s14, %s4020_s18, %s4020_s18, %s4021_s26  }
  0x38 PF: > { %221 = sbr.rel (!%p4103_p5) target bundleno = 88 (0x58), region = 32  ;;  %s222_s27 = sand.u32 (%p4103_p5), 1, %s4017_s23  }
  0x39   : > { %s224_s8 = sand.u32 (%p4103_p5), 1, %s4013_s22   ;;  %s3792_s10 = sshll.u32 (%p4103_p5), %s4017_s23, 5 }
  0x3a   : > { %s3791_s9 = sshll.u32 (%p4103_p5), %s224_s8, 8  ;;  %s228_s11 = ssub.s32 (%p4103_p5), 125, %s3792_s10 }
  0x3b   : > { %p229_p9 = scmp.lt.s32.totalorder (%p4103_p5), %s228_s11, 32  ;;  %s4172_s16 = scalar_lea.sflag (%p4103_p5), [#allocation7], %s222_s27 }
  0x3c   : > { %s226_s12 = scalar_lea.vmem (%p4103_p5), [#allocation6], %s3791_s9 }
  0x3d   : > { %s5461_s11 = smov (!%p229_p9, %s228_s11), 32 }
  0x3e   : > { %s4169_s13 = sshll.u32 %s5461_s11, 7 }
  0x3f   : > { %s233_s15 = ssub.s32 4096, %s4169_s13 }
  0x40   : > { %234 = vsyncadd %s4172_s16, %s233_s15  ;;  %p3794_p10 = scmp.ne.s32.totalorder %s4169_s13, 0  ;;  %s3816_s14 = sshll.u32 %s4017_s23, 12 }
  0x41   : > { %s4180_s17 = scalar_lea.hbm %s5442_s1, %s3816_s14  ;;  %s239_s18 = sshll.u32 %s226_s12, 4  ;;  %s4182_s18 = int_to_ptr.vmem [resolvable:$true] %s239_s18 }
  0x42   : > { %s3897_s26 = scalar_lea.hbm %s4180_s17, %s4169_s13  ;;  %s3901_s9 = scalar_lea.hbm %s5442_s1, 16000 }
  0x43   : > { %p3898_p13 = scmp.ne.s32.totalorder %s4180_s17, %s3897_s26  ;;  %p3902_p7 = scmp.lt.s32.totalorder %s4180_s17, %s5442_s1 }
  0x44   : > { %p3903_p8 = scmp.lt.s32.totalorder %s3901_s9, %s3897_s26 }
  0x45   : > { %p3899_p2 = pnand %p3898_p13, %p3794_p10 }
  0x46   : > { %p3904_p11 = por %p3903_p8, %p3902_p7 }
  0x47   : > { %p3900_p4 = pneg %p3899_p2 }
  0x49   : > { %p3905_p12 = pnand %p3904_p11, %p3900_p4 }
  0x4b   : > { %3908 = shalt.err (!%p3905_p12)
}
  0x4c   : > { %s3909_s15 = scalar_lea.vmem %s4182_s18, %s4169_s13  ;;  %s4022_s12 = smov [#allocation6]  }
  0x4d   : > { %p3910_p0 = scmp.ne.s32.totalorder %s4182_s18, %s3909_s15  ;;  %s3913_s14 = sshll.u32 %s4022_s12, 4  ;;  %s3914_s14 = int_to_ptr.vmem [resolvable:$false] %s3913_s14 }
  0x4e   : > { %s3915_s19 = scalar_lea.vmem %s3914_s14, 8192  ;;  %p3916_p9 = scmp.lt.s32.totalorder %s4182_s18, %s3914_s14 }
  0x4f   : > { %p3911_p1 = pnand %p3910_p0, %p3794_p10  ;;  %p3917_p13 = scmp.lt.s32.totalorder %s3915_s19, %s3909_s15 }
  0x51   : > { %p3912_p3 = pneg %p3911_p1  ;;  %p3918_p2 = por %p3917_p13, %p3916_p9 }
  0x53   : > { %p3919_p7 = pnand %p3918_p2, %p3912_p3 }
  0x55   : > { %3922 = shalt.err (!%p3919_p7)
}
  0x56   : > { %s4023_s24 = smov 128   ;;  %s4024_s26 = smov 8  }
  0x57   : > { %245 = dma.hbm_to_vmem [thread:$0]  (%p3794_p10), %s4180_s17, %s4169_s13, %s4182_s18, %s4172_s16, %s4023_s24, %s4023_s24, %s4024_s26  }
  0x58 PF: > { %248 = sbr.rel (!%p4103_p5) target bundleno = 120 (0x78), region = 36  ;;  %s249_s27 = sand.u32 (%p4103_p5), 1, %s4017_s23  }
  0x59   : > { %s251_s8 = sand.u32 (%p4103_p5), 1, %s4013_s22   ;;  %s3799_s10 = sshll.u32 (%p4103_p5), %s4017_s23, 5 }
  0x5a   : > { %s3798_s9 = sshll.u32 (%p4103_p5), %s251_s8, 8  ;;  %s255_s11 = ssub.s32 (%p4103_p5), 125, %s3799_s10 }
  0x5b   : > { %p256_p4 = scmp.lt.s32.totalorder (%p4103_p5), %s255_s11, 32  ;;  %s4216_s14 = scalar_lea.sflag (%p4103_p5), [#allocation7], %s249_s27 }
  0x5c   : > { %s253_s13 = scalar_lea.vmem (%p4103_p5), [#allocation8], %s3798_s9 }
  0x5d   : > { %s5463_s11 = smov (!%p256_p4, %s255_s11), 32 }
  0x5e   : > { %s4213_s15 = sshll.u32 %s5463_s11, 7 }
  0x5f   : > { %s260_s12 = ssub.s32 4096, %s4213_s15 }
  0x60   : > { %261 = vsyncadd %s4216_s14, %s260_s12  ;;  %p3801_p5 = scmp.ne.s32.totalorder %s4213_s15, 0  ;;  %s3817_s29 = sshll.u32 %s4017_s23, 12 }
  0x61   : > { %s4224_s18 = scalar_lea.hbm %s5443_s2, %s3817_s29  ;;  %s266_s19 = sshll.u32 %s253_s13, 4  ;;  %s4226_s19 = int_to_ptr.vmem [resolvable:$true] %s266_s19 }
  0x62   : > { %s3923_s24 = scalar_lea.hbm %s4224_s18, %s4213_s15  ;;  %s3927_s8 = scalar_lea.hbm %s5443_s2, 16000 }
  0x63   : > { %p3924_p10 = scmp.ne.s32.totalorder %s4224_s18, %s3923_s24  ;;  %p3928_p12 = scmp.lt.s32.totalorder %s4224_s18, %s5443_s2 }
  0x64   : > { %p3929_p0 = scmp.lt.s32.totalorder %s3927_s8, %s3923_s24 }
  0x65   : > { %p3925_p8 = pnand %p3924_p10, %p3801_p5 }
  0x66   : > { %p3930_p1 = por %p3929_p0, %p3928_p12 }
  0x67   : > { %p3926_p11 = pneg %p3925_p8 }
  0x69   : > { %p3931_p3 = pnand %p3930_p1, %p3926_p11 }
  0x6b   : > { %3934 = shalt.err (!%p3931_p3)
}
  0x6c   : > { %s3935_s11 = scalar_lea.vmem %s4226_s19, %s4213_s15  ;;  %s4025_s12 = smov [#allocation8]  }
  0x6d   : > { %p3936_p9 = scmp.ne.s32.totalorder %s4226_s19, %s3935_s11  ;;  %s3939_s13 = sshll.u32 %s4025_s12, 4  ;;  %s3940_s13 = int_to_ptr.vmem [resolvable:$false] %s3939_s13 }
  0x6e   : > { %s3941_s29 = scalar_lea.vmem %s3940_s13, 8192  ;;  %p3942_p7 = scmp.lt.s32.totalorder %s4226_s19, %s3940_s13 }
  0x6f   : > { %p3937_p13 = pnand %p3936_p9, %p3801_p5  ;;  %p3943_p4 = scmp.lt.s32.totalorder %s3941_s29, %s3935_s11 }
  0x71   : > { %p3938_p2 = pneg %p3937_p13  ;;  %p3944_p10 = por %p3943_p4, %p3942_p7 }
  0x73   : > { %p3945_p8 = pnand %p3944_p10, %p3938_p2 }
  0x75   : > { %3948 = shalt.err (!%p3945_p8)
}
  0x76   : > { %s4026_s16 = smov 128   ;;  %s4027_s17 = smov 8  }
  0x77   : > { %272 = dma.hbm_to_vmem [thread:$0]  (%p3801_p5), %s4224_s18, %s4213_s15, %s4226_s19, %s4216_s14, %s4026_s16, %s4026_s16, %s4027_s17  }
  0x78 PF: > { %p3805_p11 = scmp.ge.s32.totalorder %s4017_s23, 1  ;;  %p274_p12 = scmp.lt.s32.totalorder %s4017_s23, 5 }
  0x7a   : > { %p275_p0 = pnand %p3805_p11, %p274_p12 }
  0x7b   : > { %s4255_s24 = sand.u32 (!%p275_p0), 1, %s4009_s21  }
  0x7c   : > { %278 = sbr.rel (%p275_p0) target bundleno = 616 (0x268), region = 40  ;;  %s3806_s26 = sshll.u32 (!%p275_p0), %s4255_s24, 8 }
  0x7d   : > { %s281_s27 = scalar_lea.sflag (!%p275_p0), [#allocation4], %s4255_s24  ;;  %s4259_s8 = scalar_lea.vmem (!%p275_p0), [#allocation3], %s3806_s26 }
  0x81   : > { %3992 = dma.done.wait (%p4107_p6), %s281_s27, 4096  }
  0x82   : > { %3994 = vsyncadd (%p4107_p6), %s281_s27, 4294963200  ;;  %s289_s15 = sand.u32 1, %s4085_s4   ;;  %s4266_s18 = scalar_lea.vmem [#allocation6], %s3806_s26 }
  0x83   : > { %s290_s14 = scalar_lea.sflag [#allocation7], %s289_s15 }
  0x84   : > { %3996 = dma.done.wait (%p4107_p6), %s290_s14, 8192  }
  0x85   : > { %3998 = vsyncadd (%p4107_p6), %s290_s14, 4294959104  ;;  %v452_v0 = vlaneseq  ;;  %v355_v5 = vld [vmem:[%s4259_s8] sm:$0xff]  ;;  %s4286_s30 = scalar_lea.vmem [#allocation8], %s3806_s26  ;;  %v357_v9 = vld [vmem:[%s4259_s8 + $0x10] sm:$0xff]  ;;  %s688_s10 = sld [smem:[#allocation2]]  ;;  %vm3453_vm0 = vcmask 130112  }
  0x86   : > { %v387_v6 = vld [vmem:[%s4266_s18] sm:$0xff]  ;;  %v389_v10 = vld [vmem:[%s4266_s18 + $0x10] sm:$0xff]  ;;  %v356_v15 = vld [vmem:[%s4259_s8 + $0x8] sm:$0xff]  ;;  %vm3460_vm1 = vcmask 195712   ;;  %vm3467_vm2 = vcmask 261312   ;;  %vm3474_vm3 = vcmask 326912  }
  0x87   : > { %v4273_v1 = vshrl.u32 %v452_v0, 7  ;;  %v419_v7 = vld [vmem:[%s4286_s30] sm:$0xff]  ;;  %v421_v14 = vld [vmem:[%s4286_s30 + $0x10] sm:$0xff]  ;;  %v388_v16 = vld [vmem:[%s4266_s18 + $0x8] sm:$0xff]  ;;  %vm3481_vm4 = vcmask 392512   ;;  %vm3488_vm5 = vcmask 458112  }
  0x88   : > { %v451_v8 = vld [vmem:[%s5444_s3] sm:$0x7]  ;;  %v420_v17 = vld [vmem:[%s4286_s30 + $0x8] sm:$0xff]  ;;  %v358_v18 = vld [vmem:[%s4259_s8 + $0x18] sm:$0xff]  ;;  %vm3495_vm6 = vcmask 523712   ;;  %vm3502_vm7 = vcmask 589312  }
  0x89   : > { %v4276_v2 = vsub.s32 0, %v4273_v1  ;;  %v4279_v3 = vsub.s32 1, %v4273_v1  ;;  %v4282_v4 = vsub.s32 2, %v4273_v1  ;;  %v390_v19 = vld [vmem:[%s4266_s18 + $0x18] sm:$0xff]  ;;  %v359_v25 = vld [vmem:[%s4259_s8 + $0x20] sm:$0xff]  ;;  %v360_v36 = vld [vmem:[%s4259_s8 + $0x28] sm:$0xff] }
  0x8a   : > { %v422_v24 = vld [vmem:[%s4286_s30 + $0x18] sm:$0xff]  ;;  %v391_v30 = vld [vmem:[%s4266_s18 + $0x20] sm:$0xff]  ;;  %v392_v37 = vld [vmem:[%s4266_s18 + $0x28] sm:$0xff]  ;;  %vm3509_vm8 = vcmask 654912   ;;  %vm3516_vm9 = vcmask 720512   ;;  %vm3523_vm10 = vcmask 786112  }
  0x8b   : > { %v4295_v11 = vrot.slane %v451_v8, %v4276_v2  ;;  %v4298_v12 = vrot.slane %v451_v8, %v4279_v3  ;;  %v4301_v13 = vrot.slane %v451_v8, %v4282_v4  ;;  %v423_v35 = vld [vmem:[%s4286_s30 + $0x20] sm:$0xff]  ;;  %v361_v42 = vld [vmem:[%s4259_s8 + $0x30] sm:$0xff]  ;;  %v424_v46 = vld [vmem:[%s4286_s30 + $0x28] sm:$0xff]  ;;  %vm3530_vm11 = vcmask 851712   ;;  %s3809_s11 = sshll.u32 %s4255_s24, 1  ;;  %s3818_s12 = sshll.u32 %s4085_s4, 5 }
  0x8c   : > { %v393_v47 = vld [vmem:[%s4266_s18 + $0x30] sm:$0xff]  ;;  %v362_v48 = vld [vmem:[%s4259_s8 + $0x38] sm:$0xff]  ;;  %v364_v8 = vld [vmem:[%s4259_s8 + $0x48] sm:$0xff]  ;;  %vm3537_vm12 = vcmask 917312   ;;  %vm3544_vm13 = vcmask 982912   ;;  %vm3551_vm14 = vcmask 1048512   ;;  %s3666_s26 = scalar_lea.hbm %s5446_s5, %s3818_s12 }
  0x8d   : > { %v456_v20 = vmul.f32 %v4295_v11, %v355_v5  ;;  %v492_v21 = vmul.f32 %v4298_v12, %v387_v6  ;;  %v560_v22 = vmul.f32 %v4301_v13, %v419_v7  ;;  %v458_v23 = vmul.f32 %v4295_v11, %v357_v9  ;;  %v394_v53 = vld [vmem:[%s4266_s18 + $0x38] sm:$0xff]  ;;  %v425_v57 = vld [vmem:[%s4286_s30 + $0x30] sm:$0xff]  ;;  %v363_v5 = vld [vmem:[%s4259_s8 + $0x40] sm:$0xff]  ;;  %s338_s13 = scalar_lea.vmem [#allocation9], %s3809_s11  ;;  %s3654_s27 = scalar_lea.sflag [#allocation5], %s4255_s24 }
  0x8e   : > { %v494_v26 = vmul.f32 %v4298_v12, %v389_v10  ;;  %v562_v27 = vmul.f32 %v4301_v13, %v421_v14  ;;  %v457_v28 = vmul.f32 %v4295_v11, %v356_v15  ;;  %v493_v29 = vmul.f32 %v4298_v12, %v388_v16  ;;  %v426_v62 = vld [vmem:[%s4286_s30 + $0x38] sm:$0xff]  ;;  %v395_v6 = vld [vmem:[%s4266_s18 + $0x40] sm:$0xff]  ;;  %v396_v9 = vld [vmem:[%s4266_s18 + $0x48] sm:$0xff]  ;;  %s3668_s29 = sshll.u32 %s338_s13, 4  ;;  %p5452_p5 = scmp.ne.s32.totalorder %s5450_s6, 0  ;;  %s3669_s29 = int_to_ptr.vmem [resolvable:$true] %s3668_s29 }
  0x8f   : > { %v524_v31 = vadd.f32 %v492_v21, %v456_v20  ;;  %v561_v32 = vmul.f32 %v4301_v13, %v420_v17  ;;  %v459_v33 = vmul.f32 %v4295_v11, %v358_v18  ;;  %v495_v34 = vmul.f32 %v4298_v12, %v390_v19  ;;  %v427_v17 = vld [vmem:[%s4286_s30 + $0x40] sm:$0xff]  ;;  %v428_v20 = vld [vmem:[%s4286_s30 + $0x48] sm:$0xff]  ;;  %s4030_s4 = smov [#allocation9]  }
  0x90   : > { %v526_v38 = vadd.f32 %v494_v26, %v458_v23  ;;  %v525_v39 = vadd.f32 %v493_v29, %v457_v28  ;;  %v563_v40 = vmul.f32 %v4301_v13, %v422_v24  ;;  %v460_v41 = vmul.f32 %v4295_v11, %v359_v25  ;;  %v365_v25 = vld [vmem:[%s4259_s8 + $0x50] sm:$0xff]  ;;  %v398_v28 = vld [vmem:[%s4266_s18 + $0x58] sm:$0xff]  ;;  %s3953_s15 = sshll.u32 %s4030_s4, 4  ;;  %s3954_s15 = int_to_ptr.vmem [resolvable:$false] %s3953_s15 }
  0x91   : > { %v592_v43 = vadd.f32 %v560_v22, %v524_v31  ;;  %v527_v44 = vadd.f32 %v495_v34, %v459_v33  ;;  %v496_v45 = vmul.f32 %v4298_v12, %v391_v30  ;;  %v564_v50 = vmul.f32 %v4301_v13, %v423_v35  ;;  %v397_v26 = vld [vmem:[%s4266_s18 + $0x50] sm:$0xff]  ;;  %v367_v35 = vld [vmem:[%s4259_s8 + $0x60] sm:$0xff]  ;;  %s3955_s14 = scalar_lea.vmem %s3954_s15, 64  ;;  %p3956_p9 = scmp.lt.s32.totalorder %s3669_s29, %s3954_s15 }
  0x92   : > { %v594_v49 = vadd.f32 %v562_v27, %v526_v38  ;;  %v461_v51 = vmul.f32 %v4295_v11, %v360_v36  ;;  %v497_v52 = vmul.f32 %v4298_v12, %v392_v37  ;;  %v593_v54 = vadd.f32 %v561_v32, %v525_v39  ;;  %v366_v27 = vld [vmem:[%s4259_s8 + $0x58] sm:$0xff]  ;;  %v399_v36 = vld [vmem:[%s4266_s18 + $0x60] sm:$0xff]  ;;  %v429_v39 = vld [vmem:[%s4286_s30 + $0x50] sm:$0xff] }
  0x93   : > { %624 = vadd.xlane.f32.xlu0 %v592_v43  ;;  %v595_v55 = vadd.f32 %v563_v40, %v527_v44  ;;  %v528_v56 = vadd.f32 %v496_v45, %v460_v41  ;;  %v462_v58 = vmul.f32 %v4295_v11, %v361_v42  ;;  %v565_v60 = vmul.f32 %v4301_v13, %v424_v46  ;;  %v430_v40 = vld [vmem:[%s4286_s30 + $0x58] sm:$0xff]  ;;  %v368_v43 = vld [vmem:[%s4259_s8 + $0x68] sm:$0xff] }
  0x94   : > { %628 = vadd.xlane.f32.xlu1 %v594_v49  ;;  %v529_v59 = vadd.f32 %v497_v52, %v461_v51  ;;  %v498_v61 = vmul.f32 %v4298_v12, %v393_v47  ;;  %v463_v63 = vmul.f32 %v4295_v11, %v362_v48  ;;  %v499_v7 = vmul.f32 %v4298_v12, %v394_v53  ;;  %v400_v44 = vld [vmem:[%s4266_s18 + $0x68] sm:$0xff]  ;;  %v431_v51 = vld [vmem:[%s4286_s30 + $0x60] sm:$0xff] }
  0x95   : > { %v596_v10 = vadd.f32 %v564_v50, %v528_v56  ;;  %v566_v14 = vmul.f32 %v4301_v13, %v425_v57  ;;  %v567_v16 = vmul.f32 %v4301_v13, %v426_v62  ;;  %v464_v18 = vmul.f32 %v4295_v11, %v363_v5  ;;  %v369_v57 = vld [vmem:[%s4259_s8 + $0x70] sm:$0xff] }
  0x96   : > { %v530_v15 = vadd.f32 %v498_v61, %v462_v58  ;;  %v500_v19 = vmul.f32 %v4298_v12, %v395_v6  ;;  %v597_v21 = vadd.f32 %v565_v60, %v529_v59  ;;  %v531_v22 = vadd.f32 %v499_v7, %v463_v63  ;;  %v401_v58 = vld [vmem:[%s4266_s18 + $0x70] sm:$0xff]  ;;  %v370_v59 = vld [vmem:[%s4259_s8 + $0x78] sm:$0xff] }
  0x97   : > { %626 = vadd.xlane.f32.xlu0 %v593_v54  ;;  %v465_v23 = vmul.f32 %v4295_v11, %v364_v8  ;;  %v501_v24 = vmul.f32 %v4298_v12, %v396_v9  ;;  %v568_v29 = vmul.f32 %v4301_v13, %v427_v17  ;;  %v569_v30 = vmul.f32 %v4301_v13, %v428_v20  ;;  %v432_v54 = vld [vmem:[%s4286_s30 + $0x68] sm:$0xff]  ;;  %v402_v60 = vld [vmem:[%s4266_s18 + $0x78] sm:$0xff]  ;;  %v433_v6 = vld [vmem:[%s4286_s30 + $0x70] sm:$0xff] }
  0x98   : > { %630 = vadd.xlane.f32.xlu1 %v595_v55  ;;  %v598_v31 = vadd.f32 %v566_v14, %v530_v15  ;;  %v532_v32 = vadd.f32 %v500_v19, %v464_v18  ;;  %v466_v33 = vmul.f32 %v4295_v11, %v365_v25  ;;  %v502_v34 = vmul.f32 %v4298_v12, %v397_v26  ;;  %v434_v14 = vld [vmem:[%s4286_s30 + $0x78] sm:$0xff]  ;;  %v371_v17 = vld [vmem:[%s4259_s8 + $0x80] sm:$0xff]  ;;  %v372_v19 = vld [vmem:[%s4259_s8 + $0x88] sm:$0xff] }
  0x99   : > { %v599_v37 = vadd.f32 %v567_v16, %v531_v22  ;;  %v533_v38 = vadd.f32 %v501_v24, %v465_v23  ;;  %v467_v41 = vmul.f32 %v4295_v11, %v366_v27  ;;  %v503_v42 = vmul.f32 %v4298_v12, %v398_v28  ;;  %v403_v18 = vld [vmem:[%s4266_s18 + $0x80] sm:$0xff]  ;;  %v404_v20 = vld [vmem:[%s4266_s18 + $0x88] sm:$0xff]  ;;  %v373_v28 = vld [vmem:[%s4259_s8 + $0x90] sm:$0xff] }
  0x9a   : > { %v468_v45 = vmul.f32 %v4295_v11, %v367_v35  ;;  %v504_v46 = vmul.f32 %v4298_v12, %v399_v36  ;;  %v600_v47 = vadd.f32 %v568_v29, %v532_v32  ;;  %v534_v48 = vadd.f32 %v502_v34, %v466_v33  ;;  %v435_v25 = vld [vmem:[%s4286_s30 + $0x80] sm:$0xff]  ;;  %v405_v29 = vld [vmem:[%s4266_s18 + $0x90] sm:$0xff]  ;;  %v374_v34 = vld [vmem:[%s4259_s8 + $0x98] sm:$0xff] }
  0x9b   : > { %632 = vadd.xlane.f32.xlu0 %v596_v10  ;;  %v570_v49 = vmul.f32 %v4301_v13, %v429_v39  ;;  %v571_v50 = vmul.f32 %v4301_v13, %v430_v40  ;;  %v601_v52 = vadd.f32 %v569_v30, %v533_v38  ;;  %v535_v53 = vadd.f32 %v503_v42, %v467_v41  ;;  %v406_v35 = vld [vmem:[%s4266_s18 + $0x98] sm:$0xff]  ;;  %v436_v36 = vld [vmem:[%s4286_s30 + $0x88] sm:$0xff]  ;;  %v437_v42 = vld [vmem:[%s4286_s30 + $0x90] sm:$0xff] }
  0x9c   : > { %634 = vadd.xlane.f32.xlu1 %v597_v21  ;;  %v469_v55 = vmul.f32 %v4295_v11, %v368_v43  ;;  %v505_v56 = vmul.f32 %v4298_v12, %v400_v44  ;;  %v536_v61 = vadd.f32 %v504_v46, %v468_v45  ;;  %v572_v62 = vmul.f32 %v4301_v13, %v431_v51  ;;  %v375_v45 = vld [vmem:[%s4259_s8 + $0xa0] sm:$0xff]  ;;  %v376_v51 = vld [vmem:[%s4259_s8 + $0xa8] sm:$0xff] }
  0x9d   : > { %v602_v63 = vadd.f32 %v570_v49, %v534_v48  ;;  %v573_v5 = vmul.f32 %v4301_v13, %v432_v54  ;;  %v470_v7 = vmul.f32 %v4295_v11, %v369_v57  ;;  %v506_v8 = vmul.f32 %v4298_v12, %v401_v58  ;;  %v407_v46 = vld [vmem:[%s4266_s18 + $0xa0] sm:$0xff] }
  0x9e   : > { %v603_v9 = vadd.f32 %v571_v50, %v535_v53  ;;  %v537_v10 = vadd.f32 %v505_v56, %v469_v55  ;;  %v471_v15 = vmul.f32 %v4295_v11, %v370_v59  ;;  %v507_v16 = vmul.f32 %v4298_v12, %v402_v60  ;;  %v438_v50 = vld [vmem:[%s4286_s30 + $0x98] sm:$0xff]  ;;  %v439_v60 = vld [vmem:[%s4286_s30 + $0xa0] sm:$0xff] }
  0x9f   : > { %636 = vadd.xlane.f32.xlu0 %v598_v31  ;;  %v604_v21 = vadd.f32 %v572_v62, %v536_v61  ;;  %v574_v22 = vmul.f32 %v4301_v13, %v433_v6  ;;  %v538_v23 = vadd.f32 %v506_v8, %v470_v7  ;;  %v575_v24 = vmul.f32 %v4301_v13, %v434_v14  ;;  %v440_v62 = vld [vmem:[%s4286_s30 + $0xa8] sm:$0xff]  ;;  %v377_v6 = vld [vmem:[%s4259_s8 + $0xb0] sm:$0xff]  ;;  %v378_v8 = vld [vmem:[%s4259_s8 + $0xb8] sm:$0xff] }
  0xa0   : > { %638 = vadd.xlane.f32.xlu1 %v599_v37  ;;  %v472_v26 = vmul.f32 %v4295_v11, %v371_v17  ;;  %v508_v27 = vmul.f32 %v4298_v12, %v403_v18  ;;  %v605_v30 = vadd.f32 %v573_v5, %v537_v10  ;;  %v539_v31 = vadd.f32 %v507_v16, %v471_v15  ;;  %v409_v7 = vld [vmem:[%s4266_s18 + $0xb0] sm:$0xff] }
  0xa1   : > { %v473_v32 = vmul.f32 %v4295_v11, %v372_v19  ;;  %v509_v33 = vmul.f32 %v4298_v12, %v404_v20  ;;  %v576_v37 = vmul.f32 %v4301_v13, %v435_v25  ;;  %v474_v38 = vmul.f32 %v4295_v11, %v373_v28  ;;  %v441_v18 = vld [vmem:[%s4286_s30 + $0xb0] sm:$0xff]  ;;  %v379_v25 = vld [vmem:[%s4259_s8 + $0xc0] sm:$0xff]  ;;  %v412_v28 = vld [vmem:[%s4266_s18 + $0xc8] sm:$0xff] }
  0xa2   : > { %v510_v39 = vmul.f32 %v4298_v12, %v405_v29  ;;  %v606_v40 = vadd.f32 %v574_v22, %v538_v23  ;;  %v540_v41 = vadd.f32 %v508_v27, %v472_v26  ;;  %v475_v43 = vmul.f32 %v4295_v11, %v374_v34  ;;  %v442_v22 = vld [vmem:[%s4286_s30 + $0xb8] sm:$0xff]  ;;  %v411_v26 = vld [vmem:[%s4266_s18 + $0xc0] sm:$0xff]  ;;  %v380_v27 = vld [vmem:[%s4259_s8 + $0xc8] sm:$0xff] }
  0xa3   : > { %640 = vadd.xlane.f32.xlu0 %v600_v47  ;;  %v511_v44 = vmul.f32 %v4298_v12, %v406_v35  ;;  %v607_v47 = vadd.f32 %v575_v24, %v539_v31  ;;  %v541_v48 = vadd.f32 %v509_v33, %v473_v32  ;;  %v577_v49 = vmul.f32 %v4301_v13, %v436_v36  ;;  %v381_v36 = vld [vmem:[%s4259_s8 + $0xd0] sm:$0xff] }
  0xa4   : > { %642 = vadd.xlane.f32.xlu1 %v601_v52  ;;  %v408_v52 = vld [vmem:[%s4266_s18 + $0xa8] sm:$0xff]  ;;  %v542_v53 = vadd.f32 %v510_v39, %v474_v38  ;;  %v578_v54 = vmul.f32 %v4301_v13, %v437_v42  ;;  %v476_v55 = vmul.f32 %v4295_v11, %v375_v45  ;;  %v512_v56 = vmul.f32 %v4298_v12, %v407_v46  ;;  %v414_v45 = vld [vmem:[%s4266_s18 + $0xd8] sm:$0xff] }
  0xa5   : > { %v608_v57 = vadd.f32 %v576_v37, %v540_v41  ;;  %v543_v58 = vadd.f32 %v511_v44, %v475_v43  ;;  %v579_v59 = vmul.f32 %v4301_v13, %v438_v50  ;;  %v609_v61 = vadd.f32 %v577_v49, %v541_v48  ;;  %v413_v37 = vld [vmem:[%s4266_s18 + $0xd0] sm:$0xff]  ;;  %v444_v41 = vld [vmem:[%s4286_s30 + $0xc8] sm:$0xff]  ;;  %v382_v44 = vld [vmem:[%s4259_s8 + $0xd8] sm:$0xff] }
  0xa6   : > { %v513_v5 = vmul.f32 %v4298_v12, %v408_v52  ;;  %v610_v10 = vadd.f32 %v578_v54, %v542_v53  ;;  %v544_v14 = vadd.f32 %v512_v56, %v476_v55  ;;  %v580_v15 = vmul.f32 %v4301_v13, %v439_v60  ;;  %v445_v52 = vld [vmem:[%s4286_s30 + $0xd0] sm:$0xff]  ;;  %v446_v55 = vld [vmem:[%s4286_s30 + $0xd8] sm:$0xff]  ;;  %v384_v60 = vld [vmem:[%s4259_s8 + $0xe8] sm:$0xff] }
  0xa7   : > { %644 = vadd.xlane.f32.xlu0 %v602_v63  ;;  %v477_v63 = vmul.f32 %v4295_v11, %v376_v51  ;;  %v611_v16 = vadd.f32 %v579_v59, %v543_v58  ;;  %v581_v17 = vmul.f32 %v4301_v13, %v440_v62  ;;  %v478_v19 = vmul.f32 %v4295_v11, %v377_v6  ;;  %v383_v58 = vld [vmem:[%s4259_s8 + $0xe0] sm:$0xff] }
  0xa8   : > { %646 = vadd.xlane.f32.xlu1 %v603_v9  ;;  %v410_v9 = vld [vmem:[%s4266_s18 + $0xb8] sm:$0xff]  ;;  %v514_v20 = vmul.f32 %v4298_v12, %v409_v7  ;;  %v479_v23 = vmul.f32 %v4295_v11, %v378_v8  ;;  %v4028_v29 = vmov 0   ;;  %v582_v31 = vmul.f32 %v4301_v13, %v441_v18  ;;  %v415_v59 = vld [vmem:[%s4266_s18 + $0xe0] sm:$0xff]  ;;  %v385_v18 = vld [vmem:[%s4259_s8 + $0xf0] sm:$0xff] }
  0xa9   : > { %v515_v24 = vmul.f32 %v4298_v12, %v410_v9  ;;  %3869 = vset.pattern.permute.xlu0 %v4028_v29  ;;  %3870 = vset.pattern.permute.xlu1 %v4028_v29  ;;  %v583_v33 = vmul.f32 %v4301_v13, %v442_v22  ;;  %v480_v34 = vmul.f32 %v4295_v11, %v379_v25  ;;  %v447_v7 = vld [vmem:[%s4286_s30 + $0xe0] sm:$0xff]  ;;  %vm3650_vm15 = vcmp.lt.s32.totalorder %v452_v0, 256 }
  0xaa   : > { %v546_v32 = vadd.f32 %v514_v20, %v478_v19  ;;  %v516_v35 = vmul.f32 %v4298_v12, %v411_v26  ;;  %v481_v42 = vmul.f32 %v4295_v11, %v380_v27  ;;  %v517_v43 = vmul.f32 %v4298_v12, %v412_v28  ;;  %v417_v19 = vld [vmem:[%s4266_s18 + $0xf0] sm:$0xff]  ;;  %v386_v20 = vld [vmem:[%s4259_s8 + $0xf8] sm:$0xff]  ;;  %s3949_s8 = scalar_lea.vmem %s3669_s29, 32 }
  0xab   : > { %648 = vadd.xlane.f32.xlu0 %v604_v21  ;;  %v545_v21 = vadd.f32 %v513_v5, %v477_v63  ;;  %v547_v39 = vadd.f32 %v515_v24, %v479_v23  ;;  %v482_v46 = vmul.f32 %v4295_v11, %v381_v36  ;;  %v585_v51 = vmul.f32 %v4301_v13, %v444_v41  ;;  %p3950_p6 = scmp.ne.s32.totalorder %s3669_s29, %s3949_s8  ;;  %p3957_p13 = scmp.lt.s32.totalorder %s3955_s14, %s3949_s8 }
  0xac   : > { %650 = vadd.xlane.f32.xlu1 %v605_v30  ;;  %v612_v30 = vadd.f32 %v580_v15, %v544_v14  ;;  %v614_v48 = vadd.f32 %v582_v31, %v546_v32  ;;  %v548_v49 = vadd.f32 %v516_v35, %v480_v34  ;;  %v549_v54 = vadd.f32 %v517_v43, %v481_v42  ;;  %v448_v15 = vld [vmem:[%s4286_s30 + $0xe8] sm:$0xff] }
  0xad   : > { %v613_v38 = vadd.f32 %v581_v17, %v545_v21  ;;  %v615_v53 = vadd.f32 %v583_v33, %v547_v39  ;;  %v483_v56 = vmul.f32 %v4295_v11, %v382_v44  ;;  %v586_v63 = vmul.f32 %v4301_v13, %v445_v52  ;;  %v418_v21 = vld [vmem:[%s4266_s18 + $0xf8] sm:$0xff]  ;;  %p3951_p1 = pnand %p3950_p6, %p5452_p5  ;;  %p3958_p2 = por %p3957_p13, %p3956_p9 }
  0xae   : > { %v587_v6 = vmul.f32 %v4301_v13, %v446_v55  ;;  %v484_v8 = vmul.f32 %v4295_v11, %v383_v58  ;;  %v520_v9 = vmul.f32 %v4298_v12, %v415_v59  ;;  %v588_v23 = vmul.f32 %v4301_v13, %v447_v7  ;;  %v450_v33 = vld [vmem:[%s4286_s30 + $0xf8] sm:$0xff] }
  0xaf   : > { %652 = vadd.xlane.f32.xlu0 %v606_v40  ;;  %v443_v40 = vld [vmem:[%s4286_s30 + $0xc0] sm:$0xff]  ;;  %v589_v25 = vmul.f32 %v4301_v13, %v448_v15  ;;  %v486_v26 = vmul.f32 %v4295_v11, %v385_v18  ;;  %v522_v27 = vmul.f32 %v4298_v12, %v417_v19  ;;  %v487_v31 = vmul.f32 %v4295_v11, %v386_v20  ;;  %p3952_p3 = pneg %p3951_p1 }
  0xb0   : > { %654 = vadd.xlane.f32.xlu1 %v607_v47  ;;  %v518_v47 = vmul.f32 %v4298_v12, %v413_v37  ;;  %v584_v50 = vmul.f32 %v4301_v13, %v443_v40  ;;  %v552_v24 = vadd.f32 %v520_v9, %v484_v8  ;;  %v523_v32 = vmul.f32 %v4298_v12, %v418_v21 }
  0xb1   : > { %v554_v35 = vadd.f32 %v522_v27, %v486_v26  ;;  %v591_v39 = vmul.f32 %v4301_v13, %v450_v33  ;;  %v4490_v42 = vstv %s688_s10  ;;  %v4493_v44 = vsub.s32 3, %v4273_v1  ;;  %p3959_p7 = pnand %p3958_p2, %p3952_p3 }
  0xb2   : > { %v550_v62 = vadd.f32 %v518_v47, %v482_v46  ;;  %v616_v5 = vadd.f32 %v584_v50, %v548_v49  ;;  %v620_v34 = vadd.f32 %v588_v23, %v552_v24  ;;  %v4496_v46 = vsub.s32 4, %v4273_v1 }
  0xb3   : > { %656 = vadd.xlane.f32.xlu0 %v608_v57  ;;  %v519_v57 = vmul.f32 %v4298_v12, %v414_v45  ;;  %v4502_v47 = vsub.s32 6, %v4273_v1 }
  0xb4   : > { %658 = vadd.xlane.f32.xlu1 %v609_v61  ;;  %v416_v61 = vld [vmem:[%s4266_s18 + $0xe8] sm:$0xff]  ;;  %v618_v22 = vadd.f32 %v586_v63, %v550_v62 }
  0xb5   : > { %v551_v14 = vadd.f32 %v519_v57, %v483_v56  ;;  %v521_v17 = vmul.f32 %v4298_v12, %v416_v61 }
  0xb7   : > { %660 = vadd.xlane.f32.xlu0 %v610_v10  ;;  %v617_v10 = vadd.f32 %v585_v51, %v549_v54  ;;  %v619_v28 = vadd.f32 %v587_v6, %v551_v14 }
  0xb8   : > { %662 = vadd.xlane.f32.xlu1 %v611_v16  ;;  %v485_v16 = vmul.f32 %v4295_v11, %v384_v60  ;;  %v4029_v11 = vmov 1966171168  }
  0xb9   : > { %v1783_v12 = vunpack.c.l.s4 %v4029_v11 }
  0xba   : > { %v553_v29 = vadd.f32 %v521_v17, %v485_v16 }
  0xbb   : > { %664 = vadd.xlane.f32.xlu0 %v612_v30  ;;  %v449_v30 = vld [vmem:[%s4286_s30 + $0xf0] sm:$0xff]  ;;  %v1784_v43 = vunpack.c.0.s8 %v1783_v12 }
  0xbc   : > { %666 = vadd.xlane.f32.xlu1 %v613_v38  ;;  %v590_v36 = vmul.f32 %v4301_v13, %v449_v30  ;;  %v621_v37 = vadd.f32 %v589_v25, %v553_v29  ;;  %v555_v38 = vadd.f32 %v523_v32, %v487_v31  ;;  %v4499_v13 = vsub.s32 5, %v4273_v1 }
  0xbd   : > { %v4512_v52 = vsub.s32 %v1784_v43, %v4273_v1 }
  0xbe   : > { %v622_v40 = vadd.f32 %v590_v36, %v554_v35  ;;  %v623_v41 = vadd.f32 %v591_v39, %v555_v38 }
  0xbf   : > { %668 = vadd.xlane.f32.xlu0 %v614_v48  ;;  %v4505_v48 = vsub.s32 7, %v4273_v1 }
  0xc0   : > { %670 = vadd.xlane.f32.xlu1 %v615_v53 }
  0xc3   : > { %672 = vadd.xlane.f32.xlu0 %v616_v5 }
  0xc4   : > { %674 = vadd.xlane.f32.xlu1 %v617_v10 }
  0xc7   : > { %676 = vadd.xlane.f32.xlu0 %v618_v22 }
  0xc8   : > { %678 = vadd.xlane.f32.xlu1 %v619_v28 }
  0xcb   : > { %680 = vadd.xlane.f32.xlu0 %v620_v34 }
  0xcc   : > { %682 = vadd.xlane.f32.xlu1 %v621_v37 }
  0xcf   : > { %684 = vadd.xlane.f32.xlu0 %v622_v40 }
  0xd0   : > { %686 = vadd.xlane.f32.xlu1 %v623_v41 }
 0x11c   : > { %v625_v45 = vpop.xlane.xlu0 %624 }
 0x11d   : > { %v690_v49 = vadd.f32 %v4490_v42, %v625_v45  ;;  %v629_v50 = vpop.xlane.xlu1 %628 }
 0x11e   : > { %v4509_v51 = vadd.f32 %v4490_v42, %v629_v50 }
 0x11f   : > { %v757_v53 = vrot.slane %v690_v49, %v4276_v2  ;;  %v761_v54 = vrot.slane %v690_v49, %v4279_v3  ;;  %v765_v55 = vrot.slane %v690_v49, %v4282_v4  ;;  %v769_v56 = vrot.slane %v690_v49, %v4493_v44 }
 0x120   : > { %v627_v57 = vpop.xlane.xlu0 %626  ;;  %v773_v58 = vrot.slane %v690_v49, %v4496_v46  ;;  %v777_v59 = vrot.slane %v690_v49, %v4499_v13  ;;  %v781_v60 = vrot.slane %v690_v49, %v4502_v47  ;;  %v785_v61 = vrot.slane %v690_v49, %v4505_v48 }
 0x121   : > { %v691_v62 = vadd.f32 %v4490_v42, %v627_v57  ;;  %v631_v63 = vpop.xlane.xlu1 %630  ;;  %v1778_v5 = vcombine.low %v757_v53, %v761_v54  ;;  %v1779_v6 = vcombine.low %v765_v55, %v769_v56  ;;  %v821_v7 = vrot.slane %v4509_v51, %v4276_v2 }
 0x122   : > { %v4526_v8 = vadd.f32 %v4490_v42, %v631_v63  ;;  %v1780_v9 = vcombine.low %v773_v58, %v777_v59  ;;  %v1781_v10 = vcombine.low %v781_v60, %v785_v61  ;;  %v825_v14 = vrot.slane %v4509_v51, %v4279_v3 }
 0x123   : > { %v1788_v15 = vrot.slane %v1778_v5, %v4512_v52  ;;  %v1795_v16 = vrot.slane %v1779_v6, %v4512_v52  ;;  %v789_v17 = vrot.slane %v691_v62, %v4276_v2  ;;  %v793_v18 = vrot.slane %v691_v62, %v4279_v3 }
 0x124   : > { %v633_v19 = vpop.xlane.xlu0 %632  ;;  %v1802_v20 = vrot.slane %v1780_v9, %v4512_v52  ;;  %v1809_v21 = vrot.slane %v1781_v10, %v4512_v52  ;;  %v797_v22 = vrot.slane %v691_v62, %v4282_v4  ;;  %v801_v23 = vrot.slane %v691_v62, %v4493_v44 }
 0x125   : > { %v4539_v24 = vadd.f32 %v4490_v42, %v633_v19  ;;  %v635_v25 = vpop.xlane.xlu1 %634  ;;  %v1810_v26 = vcombine.low %v1788_v15, %v1795_v16  ;;  %v805_v27 = vrot.slane %v691_v62, %v4496_v46  ;;  %v809_v28 = vrot.slane %v691_v62, %v4499_v13 }
 0x126   : > { %v4544_v29 = vadd.f32 %v4490_v42, %v635_v25  ;;  %v1811_v30 = vcombine.low %v1802_v20, %v1809_v21  ;;  %v813_v31 = vrot.slane %v691_v62, %v4502_v47  ;;  %v817_v32 = vrot.slane %v691_v62, %v4505_v48 }
 0x127   : > { %v1818_v33 = vrot.slane %v1810_v26, %v4512_v52  ;;  %v1827_v34 = vcombine.low %v789_v17, %v793_v18  ;;  %v1828_v35 = vcombine.low %v797_v22, %v801_v23  ;;  %v1829_v36 = vcombine.low %v805_v27, %v809_v28 }
 0x128   : > { %v637_v37 = vpop.xlane.xlu0 %636  ;;  %v1825_v38 = vrot.slane %v1811_v30, %v4512_v52  ;;  %v1830_v39 = vcombine.low %v813_v31, %v817_v32  ;;  %v829_v40 = vrot.slane %v4509_v51, %v4282_v4  ;;  %v833_v41 = vrot.slane %v4509_v51, %v4493_v44 }
 0x129   : > { %v4555_v11 = vadd.f32 %v4490_v42, %v637_v37  ;;  %v639_v12 = vpop.xlane.xlu1 %638  ;;  %v1837_v43 = vrot.slane %v1827_v34, %v4512_v52  ;;  %v1844_v45 = vrot.slane %v1828_v35, %v4512_v52  ;;  %v1851_v49 = vrot.slane %v1829_v36, %v4512_v52 }
 0x12a   : > { %v1826_v50 = vcombine.low %v1818_v33, %v1825_v38  ;;  %v4561_v53 = vadd.f32 %v4490_v42, %v639_v12  ;;  %v1858_v54 = vrot.slane %v1830_v39, %v4512_v52  ;;  %v837_v55 = vrot.slane %v4509_v51, %v4496_v46 }
 0x12b   : > { %v1859_v56 = vcombine.low %v1837_v43, %v1844_v45  ;;  %v841_v57 = vrot.slane %v4509_v51, %v4499_v13  ;;  %v845_v58 = vrot.slane %v4509_v51, %v4502_v47  ;;  %v849_v59 = vrot.slane %v4509_v51, %v4505_v48 }
 0x12c   : > { %3347 = vperm.xlu0 %3869, %v1826_v50   ;;  %v641_v60 = vpop.xlane.xlu0 %640  ;;  %v1860_v61 = vcombine.low %v1851_v49, %v1858_v54  ;;  %v1876_v62 = vcombine.low %v821_v7, %v825_v14  ;;  %v1877_v63 = vcombine.low %v829_v40, %v833_v41  ;;  %v853_v5 = vrot.slane %v4526_v8, %v4276_v2 }
 0x12d   : > { %v4575_v6 = vadd.f32 %v4490_v42, %v641_v60  ;;  %v1867_v9 = vrot.slane %v1859_v56, %v4512_v52  ;;  %v643_v10 = vpop.xlane.xlu1 %642  ;;  %v1878_v15 = vcombine.low %v837_v55, %v841_v57  ;;  %v1879_v16 = vcombine.low %v845_v58, %v849_v59 }
 0x12e   : > { %v1874_v17 = vrot.slane %v1860_v61, %v4512_v52  ;;  %v4580_v51 = vadd.f32 %v4490_v42, %v643_v10  ;;  %v1886_v18 = vrot.slane %v1876_v62, %v4512_v52  ;;  %v1893_v7 = vrot.slane %v1877_v63, %v4512_v52 }
 0x12f   : > { %v1900_v14 = vrot.slane %v1878_v15, %v4512_v52  ;;  %v1907_v19 = vrot.slane %v1879_v16, %v4512_v52  ;;  %v857_v20 = vrot.slane %v4526_v8, %v4279_v3  ;;  %v861_v21 = vrot.slane %v4526_v8, %v4282_v4 }
 0x130   : > { %v1875_v22 = vcombine.low %v1867_v9, %v1874_v17  ;;  %v645_v23 = vpop.xlane.xlu0 %644  ;;  %v1908_v25 = vcombine.low %v1886_v18, %v1893_v7  ;;  %v865_v26 = vrot.slane %v4526_v8, %v4493_v44  ;;  %v869_v27 = vrot.slane %v4526_v8, %v4496_v46 }
 0x131   : > { %v4595_v28 = vadd.f32 %v4490_v42, %v645_v23  ;;  %v1909_v30 = vcombine.low %v1900_v14, %v1907_v19  ;;  %v647_v31 = vpop.xlane.xlu1 %646  ;;  %v873_v32 = vrot.slane %v4526_v8, %v4499_v13  ;;  %v877_v33 = vrot.slane %v4526_v8, %v4502_v47 }
 0x132   : > { %3350 = vperm.xlu1 %3870, %v1875_v22   ;;  %v1916_v34 = vrot.slane %v1908_v25, %v4512_v52  ;;  %v4603_v35 = vadd.f32 %v4490_v42, %v647_v31  ;;  %v881_v36 = vrot.slane %v4526_v8, %v4505_v48  ;;  %v1925_v37 = vcombine.low %v853_v5, %v857_v20 }
 0x133   : > { %v1923_v38 = vrot.slane %v1909_v30, %v4512_v52  ;;  %v1926_v39 = vcombine.low %v861_v21, %v865_v26  ;;  %v1927_v40 = vcombine.low %v869_v27, %v873_v32  ;;  %v885_v41 = vrot.slane %v4539_v24, %v4276_v2 }
 0x134   : > { %v649_v12 = vpop.xlane.xlu0 %648  ;;  %v1928_v43 = vcombine.low %v877_v33, %v881_v36  ;;  %v1935_v45 = vrot.slane %v1925_v37, %v4512_v52  ;;  %v889_v49 = vrot.slane %v4539_v24, %v4279_v3  ;;  %v893_v50 = vrot.slane %v4539_v24, %v4282_v4 }
 0x135   : > { %v1924_v54 = vcombine.low %v1916_v34, %v1923_v38  ;;  %v4616_v8 = vadd.f32 %v4490_v42, %v649_v12  ;;  %v1942_v55 = vrot.slane %v1926_v39, %v4512_v52  ;;  %v1949_v56 = vrot.slane %v1927_v40, %v4512_v52  ;;  %v651_v57 = vpop.xlane.xlu1 %650 }
 0x136   : > { %v1956_v58 = vrot.slane %v1928_v43, %v4512_v52  ;;  %v4622_v59 = vadd.f32 %v4490_v42, %v651_v57  ;;  %v897_v60 = vrot.slane %v4539_v24, %v4493_v44  ;;  %v901_v61 = vrot.slane %v4539_v24, %v4496_v46 }
 0x137   : > { %3353 = vperm.xlu1 %3870, %v1924_v54   ;;  %v1957_v62 = vcombine.low %v1935_v45, %v1942_v55  ;;  %v905_v63 = vrot.slane %v4539_v24, %v4499_v13  ;;  %v909_v5 = vrot.slane %v4539_v24, %v4502_v47  ;;  %v913_v9 = vrot.slane %v4539_v24, %v4505_v48 }
 0x138   : > { %v1958_v10 = vcombine.low %v1949_v56, %v1956_v58  ;;  %v653_v15 = vpop.xlane.xlu0 %652  ;;  %v1974_v16 = vcombine.low %v885_v41, %v889_v49  ;;  %v1975_v17 = vcombine.low %v893_v50, %v897_v60  ;;  %v917_v18 = vrot.slane %v4544_v29, %v4276_v2 }
 0x139   : > { %v1965_v7 = vrot.slane %v1957_v62, %v4512_v52  ;;  %v4638_v14 = vadd.f32 %v4490_v42, %v653_v15  ;;  %v1976_v19 = vcombine.low %v901_v61, %v905_v63  ;;  %v1977_v20 = vcombine.low %v909_v5, %v913_v9  ;;  %v655_v21 = vpop.xlane.xlu1 %654 }
 0x13a   : > { %v1972_v22 = vrot.slane %v1958_v10, %v4512_v52  ;;  %v1984_v23 = vrot.slane %v1974_v16, %v4512_v52  ;;  %v1991_v24 = vrot.slane %v1975_v17, %v4512_v52  ;;  %v4644_v25 = vadd.f32 %v4490_v42, %v655_v21 }
 0x13b   : > { %v1998_v26 = vrot.slane %v1976_v19, %v4512_v52  ;;  %v2005_v27 = vrot.slane %v1977_v20, %v4512_v52  ;;  %v921_v30 = vrot.slane %v4544_v29, %v4279_v3  ;;  %v925_v31 = vrot.slane %v4544_v29, %v4282_v4 }
 0x13c   : > { %v1973_v32 = vcombine.low %v1965_v7, %v1972_v22  ;;  %v2006_v33 = vcombine.low %v1984_v23, %v1991_v24  ;;  %v657_v34 = vpop.xlane.xlu0 %656  ;;  %v929_v36 = vrot.slane %v4544_v29, %v4493_v44  ;;  %v933_v37 = vrot.slane %v4544_v29, %v4496_v46 }
 0x13d   : > { %v2007_v38 = vcombine.low %v1998_v26, %v2005_v27  ;;  %v4657_v39 = vadd.f32 %v4490_v42, %v657_v34  ;;  %v937_v40 = vrot.slane %v4544_v29, %v4499_v13  ;;  %v941_v41 = vrot.slane %v4544_v29, %v4502_v47  ;;  %v659_v50 = vpop.xlane.xlu1 %658 }
 0x13e   : > { %3356 = vperm.xlu1 %3870, %v1973_v32   ;;  %v2014_v12 = vrot.slane %v2006_v33, %v4512_v52  ;;  %v945_v43 = vrot.slane %v4544_v29, %v4505_v48  ;;  %v2023_v45 = vcombine.low %v917_v18, %v921_v30  ;;  %v2024_v49 = vcombine.low %v925_v31, %v929_v36 }
 0x13f   : > { %v2021_v54 = vrot.slane %v2007_v38, %v4512_v52  ;;  %v2025_v55 = vcombine.low %v933_v37, %v937_v40  ;;  %v4668_v56 = vadd.f32 %v4490_v42, %v659_v50  ;;  %v1045_v57 = vrot.slane %v4580_v51, %v4276_v2 }
 0x140   : > { %v2026_v58 = vcombine.low %v941_v41, %v945_v43  ;;  %v2033_v60 = vrot.slane %v2023_v45, %v4512_v52  ;;  %v2040_v61 = vrot.slane %v2024_v49, %v4512_v52  ;;  %v661_v62 = vpop.xlane.xlu0 %660  ;;  %v1049_v29 = vrot.slane %v4580_v51, %v4279_v3 }
 0x141   : > { %v2022_v63 = vcombine.low %v2014_v12, %v2021_v54  ;;  %v2047_v5 = vrot.slane %v2025_v55, %v4512_v52  ;;  %v4678_v9 = vadd.f32 %v4490_v42, %v661_v62  ;;  %v1053_v10 = vrot.slane %v4580_v51, %v4282_v4  ;;  %v663_v54 = vpop.xlane.xlu1 %662 }
 0x142   : > { %v2054_v15 = vrot.slane %v2026_v58, %v4512_v52  ;;  %v2055_v16 = vcombine.low %v2033_v60, %v2040_v61  ;;  %v1057_v17 = vrot.slane %v4580_v51, %v4493_v44  ;;  %v1061_v18 = vrot.slane %v4580_v51, %v4496_v46 }
 0x143   : > { %3359 = vperm.xlu1 %3870, %v2022_v63   ;;  %v1065_v7 = vrot.slane %v4580_v51, %v4499_v13  ;;  %v1069_v19 = vrot.slane %v4580_v51, %v4502_v47  ;;  %v1073_v20 = vrot.slane %v4580_v51, %v4505_v48  ;;  %v2219_v21 = vcombine.low %v1045_v57, %v1049_v29 }
 0x144   : > { %v2056_v22 = vcombine.low %v2047_v5, %v2054_v15  ;;  %v2063_v23 = vrot.slane %v2055_v16, %v4512_v52  ;;  %v2220_v24 = vcombine.low %v1053_v10, %v1057_v17  ;;  %v949_v26 = vrot.slane %v4555_v11, %v4276_v2  ;;  %v665_v12 = vpop.xlane.xlu0 %664 }
 0x145   : > { %v2221_v27 = vcombine.low %v1061_v18, %v1065_v7  ;;  %v2222_v30 = vcombine.low %v1069_v19, %v1073_v20  ;;  %v2229_v31 = vrot.slane %v2219_v21, %v4512_v52  ;;  %v953_v32 = vrot.slane %v4555_v11, %v4279_v3 }
 0x146   : > { %v2070_v33 = vrot.slane %v2056_v22, %v4512_v52  ;;  %v2236_v34 = vrot.slane %v2220_v24, %v4512_v52  ;;  %v957_v51 = vrot.slane %v4555_v11, %v4282_v4  ;;  %v961_v36 = vrot.slane %v4555_v11, %v4493_v44 }
 0x147   : > { %v2243_v37 = vrot.slane %v2221_v27, %v4512_v52  ;;  %v2250_v38 = vrot.slane %v2222_v30, %v4512_v52  ;;  %v965_v40 = vrot.slane %v4555_v11, %v4496_v46  ;;  %v969_v41 = vrot.slane %v4555_v11, %v4499_v13 }
 0x148   : > { %v2071_v43 = vcombine.low %v2063_v23, %v2070_v33  ;;  %v2251_v45 = vcombine.low %v2229_v31, %v2236_v34  ;;  %v973_v49 = vrot.slane %v4555_v11, %v4502_v47  ;;  %v977_v50 = vrot.slane %v4555_v11, %v4505_v48  ;;  %v669_v23 = vpop.xlane.xlu0 %668  ;;  %v667_v31 = vpop.xlane.xlu1 %666 }
 0x149   : > { %v2252_v55 = vcombine.low %v2243_v37, %v2250_v38  ;;  %v2072_v57 = vcombine.low %v949_v26, %v953_v32  ;;  %v2073_v58 = vcombine.low %v957_v51, %v961_v36  ;;  %v2074_v60 = vcombine.low %v965_v40, %v969_v41 }
 0x14a   : > { %3362 = vperm.xlu1 %3870, %v2071_v43   ;;  %v2259_v61 = vrot.slane %v2251_v45, %v4512_v52  ;;  %v2075_v62 = vcombine.low %v973_v49, %v977_v50  ;;  %v4717_v29 = vadd.f32 %v4490_v42, %v663_v54  ;;  %v4720_v63 = vadd.f32 %v4490_v42, %v665_v12 }
 0x14b   : > { %v2266_v5 = vrot.slane %v2252_v55, %v4512_v52  ;;  %v2082_v10 = vrot.slane %v2072_v57, %v4512_v52  ;;  %v2089_v11 = vrot.slane %v2073_v58, %v4512_v52  ;;  %v2096_v15 = vrot.slane %v2074_v60, %v4512_v52 }
 0x14c   : > { %v2103_v16 = vrot.slane %v2075_v62, %v4512_v52  ;;  %v981_v17 = vrot.slane %v4561_v53, %v4276_v2  ;;  %v985_v18 = vrot.slane %v4561_v53, %v4279_v3  ;;  %v989_v7 = vrot.slane %v4561_v53, %v4282_v4 }
 0x14d   : > { %v2267_v19 = vcombine.low %v2259_v61, %v2266_v5  ;;  %v2104_v20 = vcombine.low %v2082_v10, %v2089_v11  ;;  %v993_v21 = vrot.slane %v4561_v53, %v4493_v44  ;;  %v997_v22 = vrot.slane %v4561_v53, %v4496_v46 }
 0x14e   : > { %v2105_v24 = vcombine.low %v2096_v15, %v2103_v16  ;;  %v1001_v26 = vrot.slane %v4561_v53, %v4499_v13  ;;  %v1005_v27 = vrot.slane %v4561_v53, %v4502_v47  ;;  %v1009_v30 = vrot.slane %v4561_v53, %v4505_v48 }
 0x14f   : > { %3374 = vperm.xlu0 %3869, %v2267_v19   ;;  %v2112_v32 = vrot.slane %v2104_v20, %v4512_v52  ;;  %v2121_v33 = vcombine.low %v981_v17, %v985_v18  ;;  %v2122_v34 = vcombine.low %v989_v7, %v993_v21  ;;  %v4745_v51 = vadd.f32 %v4490_v42, %v667_v31  ;;  %v673_v31 = vpop.xlane.xlu0 %672 }
 0x150   : > { %v2119_v36 = vrot.slane %v2105_v24, %v4512_v52  ;;  %v2123_v37 = vcombine.low %v997_v22, %v1001_v26  ;;  %v2124_v38 = vcombine.low %v1005_v27, %v1009_v30  ;;  %v4749_v40 = vadd.f32 %v4490_v42, %v669_v23 }
 0x151   : > { %v2131_v41 = vrot.slane %v2121_v33, %v4512_v52  ;;  %v2138_v53 = vrot.slane %v2122_v34, %v4512_v52  ;;  %v1013_v12 = vrot.slane %v4575_v6, %v4276_v2  ;;  %v1017_v43 = vrot.slane %v4575_v6, %v4279_v3 }
 0x152   : > { %v2120_v45 = vcombine.low %v2112_v32, %v2119_v36  ;;  %v2145_v49 = vrot.slane %v2123_v37, %v4512_v52  ;;  %v2152_v50 = vrot.slane %v2124_v38, %v4512_v52  ;;  %v1021_v54 = vrot.slane %v4575_v6, %v4282_v4  ;;  %v671_v37 = vpop.xlane.xlu1 %670 }
 0x153   : > { %v2153_v55 = vcombine.low %v2131_v41, %v2138_v53  ;;  %v1025_v57 = vrot.slane %v4575_v6, %v4493_v44  ;;  %v1029_v58 = vrot.slane %v4575_v6, %v4496_v46  ;;  %v1033_v60 = vrot.slane %v4575_v6, %v4499_v13 }
 0x154   : > { %3365 = vperm.xlu1 %3870, %v2120_v45   ;;  %v2154_v61 = vcombine.low %v2145_v49, %v2152_v50  ;;  %v1037_v62 = vrot.slane %v4575_v6, %v4502_v47  ;;  %v1041_v5 = vrot.slane %v4575_v6, %v4505_v48  ;;  %v2170_v10 = vcombine.low %v1013_v12, %v1017_v43 }
 0x155   : > { %v2161_v11 = vrot.slane %v2153_v55, %v4512_v52  ;;  %v2171_v15 = vcombine.low %v1021_v54, %v1025_v57  ;;  %v2172_v16 = vcombine.low %v1029_v58, %v1033_v60  ;;  %v1269_v17 = vrot.slane %v4657_v39, %v4276_v2 }
 0x156   : > { %v2168_v18 = vrot.slane %v2154_v61, %v4512_v52  ;;  %v2173_v7 = vcombine.low %v1037_v62, %v1041_v5  ;;  %v2180_v19 = vrot.slane %v2170_v10, %v4512_v52  ;;  %v1273_v20 = vrot.slane %v4657_v39, %v4279_v3 }
 0x157   : > { %v2187_v21 = vrot.slane %v2171_v15, %v4512_v52  ;;  %v2194_v6 = vrot.slane %v2172_v16, %v4512_v52  ;;  %v1277_v22 = vrot.slane %v4657_v39, %v4282_v4  ;;  %v1281_v23 = vrot.slane %v4657_v39, %v4493_v44 }
 0x158   : > { %v2169_v24 = vcombine.low %v2161_v11, %v2168_v18  ;;  %v2201_v26 = vrot.slane %v2173_v7, %v4512_v52  ;;  %v1285_v27 = vrot.slane %v4657_v39, %v4496_v46  ;;  %v1289_v30 = vrot.slane %v4657_v39, %v4499_v13 }
 0x159   : > { %v2202_v32 = vcombine.low %v2180_v19, %v2187_v21  ;;  %v1293_v33 = vrot.slane %v4657_v39, %v4502_v47  ;;  %v1297_v34 = vrot.slane %v4657_v39, %v4505_v48  ;;  %v2562_v36 = vcombine.low %v1269_v17, %v1273_v20 }
 0x15a   : > { %3368 = vperm.xlu1 %3870, %v2169_v24   ;;  %v2203_v38 = vcombine.low %v2194_v6, %v2201_v26  ;;  %v2563_v41 = vcombine.low %v1277_v22, %v1281_v23  ;;  %v2564_v53 = vcombine.low %v1285_v27, %v1289_v30  ;;  %v4794_v12 = vadd.f32 %v4490_v42, %v671_v37  ;;  %v677_v37 = vpop.xlane.xlu0 %676 }
 0x15b   : > { %v2210_v43 = vrot.slane %v2202_v32, %v4512_v52  ;;  %v2565_v45 = vcombine.low %v1293_v33, %v1297_v34  ;;  %v2572_v49 = vrot.slane %v2562_v36, %v4512_v52  ;;  %v4799_v50 = vadd.f32 %v4490_v42, %v673_v31 }
 0x15c   : > { %v2217_v54 = vrot.slane %v2203_v38, %v4512_v52  ;;  %v2579_v39 = vrot.slane %v2563_v41, %v4512_v52  ;;  %v2586_v55 = vrot.slane %v2564_v53, %v4512_v52  ;;  %v1077_v57 = vrot.slane %v4595_v28, %v4276_v2 }
 0x15d   : > { %v2593_v58 = vrot.slane %v2565_v45, %v4512_v52  ;;  %v1081_v60 = vrot.slane %v4595_v28, %v4279_v3  ;;  %v1085_v61 = vrot.slane %v4595_v28, %v4282_v4  ;;  %v1089_v62 = vrot.slane %v4595_v28, %v4493_v44  ;;  %v675_v45 = vpop.xlane.xlu1 %674 }
 0x15e   : > { %v2218_v5 = vcombine.low %v2210_v43, %v2217_v54  ;;  %v2594_v10 = vcombine.low %v2572_v49, %v2579_v39  ;;  %v1093_v11 = vrot.slane %v4595_v28, %v4496_v46  ;;  %v1097_v15 = vrot.slane %v4595_v28, %v4499_v13 }
 0x15f   : > { %v2595_v16 = vcombine.low %v2586_v55, %v2593_v58  ;;  %v1101_v17 = vrot.slane %v4595_v28, %v4502_v47  ;;  %v1105_v18 = vrot.slane %v4595_v28, %v4505_v48  ;;  %v2268_v7 = vcombine.low %v1077_v57, %v1081_v60 }
 0x160   : > { %3371 = vperm.xlu1 %3870, %v2218_v5   ;;  %v2602_v19 = vrot.slane %v2594_v10, %v4512_v52  ;;  %v2269_v20 = vcombine.low %v1085_v61, %v1089_v62  ;;  %v2270_v21 = vcombine.low %v1093_v11, %v1097_v15  ;;  %v1333_v6 = vrot.slane %v4678_v9, %v4276_v2 }
 0x161   : > { %v2609_v22 = vrot.slane %v2595_v16, %v4512_v52  ;;  %v2271_v23 = vcombine.low %v1101_v17, %v1105_v18  ;;  %v2278_v24 = vrot.slane %v2268_v7, %v4512_v52  ;;  %v1337_v26 = vrot.slane %v4678_v9, %v4279_v3 }
 0x162   : > { %v2285_v27 = vrot.slane %v2269_v20, %v4512_v52  ;;  %v2292_v28 = vrot.slane %v2270_v21, %v4512_v52  ;;  %v1341_v30 = vrot.slane %v4678_v9, %v4282_v4  ;;  %v1345_v31 = vrot.slane %v4678_v9, %v4493_v44 }
 0x163   : > { %v2610_v32 = vcombine.low %v2602_v19, %v2609_v22  ;;  %v2299_v33 = vrot.slane %v2271_v23, %v4512_v52  ;;  %v1349_v34 = vrot.slane %v4678_v9, %v4496_v46  ;;  %v1353_v36 = vrot.slane %v4678_v9, %v4499_v13 }
 0x164   : > { %v2300_v38 = vcombine.low %v2278_v24, %v2285_v27  ;;  %v1357_v41 = vrot.slane %v4678_v9, %v4502_v47  ;;  %v1361_v53 = vrot.slane %v4678_v9, %v4505_v48  ;;  %v2660_v43 = vcombine.low %v1333_v6, %v1337_v26 }
 0x165   : > { %3395 = vperm.xlu0 %3869, %v2610_v32   ;;  %v2301_v49 = vcombine.low %v2292_v28, %v2299_v33  ;;  %v2661_v54 = vcombine.low %v1341_v30, %v1345_v31  ;;  %v2662_v39 = vcombine.low %v1349_v34, %v1353_v36  ;;  %v4844_v55 = vadd.f32 %v4490_v42, %v675_v45 }
 0x166   : > { %v2308_v57 = vrot.slane %v2300_v38, %v4512_v52  ;;  %v2663_v58 = vcombine.low %v1357_v41, %v1361_v53  ;;  %v2670_v60 = vrot.slane %v2660_v43, %v4512_v52  ;;  %v4849_v61 = vadd.f32 %v4490_v42, %v677_v37  ;;  %v679_v38 = vpop.xlane.xlu1 %678 }
 0x167   : > { %v2315_v62 = vrot.slane %v2301_v49, %v4512_v52  ;;  %v2677_v9 = vrot.slane %v2661_v54, %v4512_v52  ;;  %v2684_v5 = vrot.slane %v2662_v39, %v4512_v52  ;;  %v1301_v10 = vrot.slane %v4668_v56, %v4276_v2 }
 0x168   : > { %v2691_v11 = vrot.slane %v2663_v58, %v4512_v52  ;;  %v1305_v15 = vrot.slane %v4668_v56, %v4279_v3  ;;  %v1309_v16 = vrot.slane %v4668_v56, %v4282_v4  ;;  %v1313_v17 = vrot.slane %v4668_v56, %v4493_v44 }
 0x169   : > { %v2316_v18 = vcombine.low %v2308_v57, %v2315_v62  ;;  %v2692_v7 = vcombine.low %v2670_v60, %v2677_v9  ;;  %v1317_v19 = vrot.slane %v4668_v56, %v4496_v46  ;;  %v1321_v20 = vrot.slane %v4668_v56, %v4499_v13 }
 0x16a   : > { %v2693_v21 = vcombine.low %v2684_v5, %v2691_v11  ;;  %v1325_v6 = vrot.slane %v4668_v56, %v4502_v47  ;;  %v1329_v22 = vrot.slane %v4668_v56, %v4505_v48  ;;  %v2611_v23 = vcombine.low %v1301_v10, %v1305_v15 }
 0x16b   : > { %3377 = vperm.xlu1 %3870, %v2316_v18   ;;  %v2700_v24 = vrot.slane %v2692_v7, %v4512_v52  ;;  %v2612_v26 = vcombine.low %v1309_v16, %v1313_v17  ;;  %v2613_v27 = vcombine.low %v1317_v19, %v1321_v20  ;;  %v1397_v28 = vrot.slane %v4720_v63, %v4276_v2 }
 0x16c   : > { %v2707_v30 = vrot.slane %v2693_v21, %v4512_v52  ;;  %v2614_v31 = vcombine.low %v1325_v6, %v1329_v22  ;;  %v2621_v32 = vrot.slane %v2611_v23, %v4512_v52  ;;  %v1401_v33 = vrot.slane %v4720_v63, %v4279_v3 }
 0x16d   : > { %v2628_v34 = vrot.slane %v2612_v26, %v4512_v52  ;;  %v2635_v56 = vrot.slane %v2613_v27, %v4512_v52  ;;  %v1405_v36 = vrot.slane %v4720_v63, %v4282_v4  ;;  %v1409_v37 = vrot.slane %v4720_v63, %v4493_v44 }
 0x16e   : > { %v2708_v41 = vcombine.low %v2700_v24, %v2707_v30  ;;  %v2642_v53 = vrot.slane %v2614_v31, %v4512_v52  ;;  %v1413_v43 = vrot.slane %v4720_v63, %v4496_v46  ;;  %v1417_v45 = vrot.slane %v4720_v63, %v4499_v13 }
 0x16f   : > { %v2643_v49 = vcombine.low %v2621_v32, %v2628_v34  ;;  %v1421_v54 = vrot.slane %v4720_v63, %v4502_v47  ;;  %v1425_v39 = vrot.slane %v4720_v63, %v4505_v48  ;;  %v2758_v57 = vcombine.low %v1397_v28, %v1401_v33 }
 0x170   : > { %3401 = vperm.xlu0 %3869, %v2708_v41   ;;  %v2644_v58 = vcombine.low %v2635_v56, %v2642_v53  ;;  %v2759_v60 = vcombine.low %v1405_v36, %v1409_v37  ;;  %v2760_v62 = vcombine.low %v1413_v43, %v1417_v45  ;;  %v4894_v9 = vadd.f32 %v4490_v42, %v679_v38  ;;  %v681_v45 = vpop.xlane.xlu0 %680 }
 0x171   : > { %v2651_v5 = vrot.slane %v2643_v49, %v4512_v52  ;;  %v2761_v10 = vcombine.low %v1421_v54, %v1425_v39  ;;  %v2768_v11 = vrot.slane %v2758_v57, %v4512_v52  ;;  %v1365_v15 = vrot.slane %v4717_v29, %v4276_v2 }
 0x172   : > { %v2658_v16 = vrot.slane %v2644_v58, %v4512_v52  ;;  %v2775_v63 = vrot.slane %v2759_v60, %v4512_v52  ;;  %v2782_v17 = vrot.slane %v2760_v62, %v4512_v52  ;;  %v1369_v18 = vrot.slane %v4717_v29, %v4279_v3 }
 0x173   : > { %v2789_v7 = vrot.slane %v2761_v10, %v4512_v52  ;;  %v1373_v19 = vrot.slane %v4717_v29, %v4282_v4  ;;  %v1377_v20 = vrot.slane %v4717_v29, %v4493_v44  ;;  %v1381_v21 = vrot.slane %v4717_v29, %v4496_v46 }
 0x174   : > { %v2659_v6 = vcombine.low %v2651_v5, %v2658_v16  ;;  %v2790_v22 = vcombine.low %v2768_v11, %v2775_v63  ;;  %v1385_v23 = vrot.slane %v4717_v29, %v4499_v13  ;;  %v1389_v24 = vrot.slane %v4717_v29, %v4502_v47 }
 0x175   : > { %v2791_v26 = vcombine.low %v2782_v17, %v2789_v7  ;;  %v1393_v27 = vrot.slane %v4717_v29, %v4505_v48  ;;  %v2709_v28 = vcombine.low %v1365_v15, %v1369_v18  ;;  %v2710_v30 = vcombine.low %v1373_v19, %v1377_v20 }
 0x176   : > { %3398 = vperm.xlu1 %3870, %v2659_v6   ;;  %v2798_v31 = vrot.slane %v2790_v22, %v4512_v52  ;;  %v2711_v32 = vcombine.low %v1381_v21, %v1385_v23  ;;  %v1461_v33 = vrot.slane %v4749_v40, %v4276_v2  ;;  %v1465_v34 = vrot.slane %v4749_v40, %v4279_v3 }
 0x177   : > { %v2805_v56 = vrot.slane %v2791_v26, %v4512_v52  ;;  %v2712_v36 = vcombine.low %v1389_v24, %v1393_v27  ;;  %v2719_v37 = vrot.slane %v2709_v28, %v4512_v52  ;;  %v2726_v38 = vrot.slane %v2710_v30, %v4512_v52 }
 0x178   : > { %v2733_v29 = vrot.slane %v2711_v32, %v4512_v52  ;;  %v1469_v41 = vrot.slane %v4749_v40, %v4282_v4  ;;  %v1473_v53 = vrot.slane %v4749_v40, %v4493_v44  ;;  %v1477_v43 = vrot.slane %v4749_v40, %v4496_v46 }
 0x179   : > { %v2806_v49 = vcombine.low %v2798_v31, %v2805_v56  ;;  %v2740_v54 = vrot.slane %v2712_v36, %v4512_v52  ;;  %v2741_v39 = vcombine.low %v2719_v37, %v2726_v38  ;;  %v1481_v57 = vrot.slane %v4749_v40, %v4499_v13 }
 0x17a   : > { %v1485_v58 = vrot.slane %v4749_v40, %v4502_v47  ;;  %v1489_v60 = vrot.slane %v4749_v40, %v4505_v48  ;;  %v2856_v62 = vcombine.low %v1461_v33, %v1465_v34  ;;  %v2857_v5 = vcombine.low %v1469_v41, %v1473_v53 }
 0x17b   : > { %3407 = vperm.xlu0 %3869, %v2806_v49   ;;  %v2742_v10 = vcombine.low %v2733_v29, %v2740_v54  ;;  %v2749_v11 = vrot.slane %v2741_v39, %v4512_v52  ;;  %v2858_v15 = vcombine.low %v1477_v43, %v1481_v57  ;;  %v4942_v16 = vadd.f32 %v4490_v42, %v681_v45  ;;  %v683_v39 = vpop.xlane.xlu1 %682 }
 0x17c   : > { %v2859_v63 = vcombine.low %v1485_v58, %v1489_v60  ;;  %v2866_v17 = vrot.slane %v2856_v62, %v4512_v52  ;;  %v2873_v18 = vrot.slane %v2857_v5, %v4512_v52  ;;  %v1429_v7 = vrot.slane %v4745_v51, %v4276_v2 }
 0x17d   : > { %v2756_v40 = vrot.slane %v2742_v10, %v4512_v52  ;;  %v2880_v19 = vrot.slane %v2858_v15, %v4512_v52  ;;  %v1433_v20 = vrot.slane %v4745_v51, %v4279_v3  ;;  %v1437_v21 = vrot.slane %v4745_v51, %v4282_v4 }
 0x17e   : > { %v2887_v6 = vrot.slane %v2859_v63, %v4512_v52  ;;  %v2888_v22 = vcombine.low %v2866_v17, %v2873_v18  ;;  %v1441_v23 = vrot.slane %v4745_v51, %v4493_v44  ;;  %v1445_v24 = vrot.slane %v4745_v51, %v4496_v46 }
 0x17f   : > { %v2757_v26 = vcombine.low %v2749_v11, %v2756_v40  ;;  %v1449_v27 = vrot.slane %v4745_v51, %v4499_v13  ;;  %v1453_v28 = vrot.slane %v4745_v51, %v4502_v47  ;;  %v1457_v30 = vrot.slane %v4745_v51, %v4505_v48 }
 0x180   : > { %v2889_v31 = vcombine.low %v2880_v19, %v2887_v6  ;;  %v2896_v32 = vrot.slane %v2888_v22, %v4512_v52  ;;  %v2807_v33 = vcombine.low %v1429_v7, %v1433_v20  ;;  %v2808_v34 = vcombine.low %v1437_v21, %v1441_v23 }
 0x181   : > { %3404 = vperm.xlu1 %3870, %v2757_v26   ;;  %v2809_v56 = vcombine.low %v1445_v24, %v1449_v27  ;;  %v2810_v36 = vcombine.low %v1453_v28, %v1457_v30  ;;  %v1525_v37 = vrot.slane %v4799_v50, %v4276_v2  ;;  %v1529_v38 = vrot.slane %v4799_v50, %v4279_v3 }
 0x182   : > { %v2903_v29 = vrot.slane %v2889_v31, %v4512_v52  ;;  %v2817_v41 = vrot.slane %v2807_v33, %v4512_v52  ;;  %v2824_v51 = vrot.slane %v2808_v34, %v4512_v52  ;;  %v1533_v53 = vrot.slane %v4799_v50, %v4282_v4 }
 0x183   : > { %v2831_v43 = vrot.slane %v2809_v56, %v4512_v52  ;;  %v2838_v45 = vrot.slane %v2810_v36, %v4512_v52  ;;  %v1537_v49 = vrot.slane %v4799_v50, %v4493_v44  ;;  %v1541_v54 = vrot.slane %v4799_v50, %v4496_v46 }
 0x184   : > { %v2904_v57 = vcombine.low %v2896_v32, %v2903_v29  ;;  %v2839_v58 = vcombine.low %v2817_v41, %v2824_v51  ;;  %v1545_v60 = vrot.slane %v4799_v50, %v4499_v13  ;;  %v1549_v62 = vrot.slane %v4799_v50, %v4502_v47 }
 0x185   : > { %v2840_v5 = vcombine.low %v2831_v43, %v2838_v45  ;;  %v1553_v10 = vrot.slane %v4799_v50, %v4505_v48  ;;  %v2954_v11 = vcombine.low %v1525_v37, %v1529_v38  ;;  %v2955_v15 = vcombine.low %v1533_v53, %v1537_v49 }
 0x186   : > { %3413 = vperm.xlu0 %3869, %v2904_v57   ;;  %v2847_v63 = vrot.slane %v2839_v58, %v4512_v52  ;;  %v2956_v17 = vcombine.low %v1541_v54, %v1545_v60  ;;  %v4989_v18 = vadd.f32 %v4490_v42, %v683_v39  ;;  %v1493_v7 = vrot.slane %v4794_v12, %v4276_v2  ;;  %v685_v58 = vpop.xlane.xlu0 %684 }
 0x187   : > { %v2854_v40 = vrot.slane %v2840_v5, %v4512_v52  ;;  %v2957_v19 = vcombine.low %v1549_v62, %v1553_v10  ;;  %v2964_v20 = vrot.slane %v2954_v11, %v4512_v52  ;;  %v2971_v21 = vrot.slane %v2955_v15, %v4512_v52 }
 0x188   : > { %v2978_v50 = vrot.slane %v2956_v17, %v4512_v52  ;;  %v1497_v6 = vrot.slane %v4794_v12, %v4279_v3  ;;  %v1501_v22 = vrot.slane %v4794_v12, %v4282_v4  ;;  %v1505_v23 = vrot.slane %v4794_v12, %v4493_v44 }
 0x189   : > { %v2855_v24 = vcombine.low %v2847_v63, %v2854_v40  ;;  %v2985_v26 = vrot.slane %v2957_v19, %v4512_v52  ;;  %v2986_v27 = vcombine.low %v2964_v20, %v2971_v21  ;;  %v1509_v28 = vrot.slane %v4794_v12, %v4496_v46 }
 0x18a   : > { %v1513_v30 = vrot.slane %v4794_v12, %v4499_v13  ;;  %v1517_v31 = vrot.slane %v4794_v12, %v4502_v47  ;;  %v1521_v32 = vrot.slane %v4794_v12, %v4505_v48  ;;  %v2905_v33 = vcombine.low %v1493_v7, %v1497_v6 }
 0x18b   : > { %3410 = vperm.xlu1 %3870, %v2855_v24   ;;  %v2987_v34 = vcombine.low %v2978_v50, %v2985_v26  ;;  %v2994_v56 = vrot.slane %v2986_v27, %v4512_v52  ;;  %v2906_v36 = vcombine.low %v1501_v22, %v1505_v23  ;;  %v1589_v37 = vrot.slane %v4849_v61, %v4276_v2 }
 0x18c   : > { %v2907_v38 = vcombine.low %v1509_v28, %v1513_v30  ;;  %v2908_v29 = vcombine.low %v1517_v31, %v1521_v32  ;;  %v2915_v41 = vrot.slane %v2905_v33, %v4512_v52  ;;  %v1593_v51 = vrot.slane %v4849_v61, %v4279_v3 }
 0x18d   : > { %v3001_v53 = vrot.slane %v2987_v34, %v4512_v52  ;;  %v2922_v12 = vrot.slane %v2906_v36, %v4512_v52  ;;  %v1597_v43 = vrot.slane %v4849_v61, %v4282_v4  ;;  %v1601_v45 = vrot.slane %v4849_v61, %v4493_v44 }
 0x18e   : > { %v2929_v49 = vrot.slane %v2907_v38, %v4512_v52  ;;  %v2936_v54 = vrot.slane %v2908_v29, %v4512_v52  ;;  %v1605_v39 = vrot.slane %v4849_v61, %v4496_v46  ;;  %v1609_v57 = vrot.slane %v4849_v61, %v4499_v13 }
 0x18f   : > { %v3002_v60 = vcombine.low %v2994_v56, %v3001_v53  ;;  %v2937_v62 = vcombine.low %v2915_v41, %v2922_v12  ;;  %v1613_v5 = vrot.slane %v4849_v61, %v4502_v47  ;;  %v1617_v10 = vrot.slane %v4849_v61, %v4505_v48 }
 0x190   : > { %v2938_v11 = vcombine.low %v2929_v49, %v2936_v54  ;;  %v3052_v15 = vcombine.low %v1589_v37, %v1593_v51  ;;  %v3053_v63 = vcombine.low %v1597_v43, %v1601_v45  ;;  %v3054_v17 = vcombine.low %v1605_v39, %v1609_v57  ;;  %v687_v54 = vpop.xlane.xlu1 %686 }
 0x191   : > { %3419 = vperm.xlu0 %3869, %v3002_v60   ;;  %v2945_v7 = vrot.slane %v2937_v62, %v4512_v52  ;;  %v3055_v40 = vcombine.low %v1613_v5, %v1617_v10  ;;  %v5036_v19 = vadd.f32 %v4490_v42, %v685_v58  ;;  %v1557_v20 = vrot.slane %v4844_v55, %v4276_v2 }
 0x192   : > { %v2952_v21 = vrot.slane %v2938_v11, %v4512_v52  ;;  %v3062_v50 = vrot.slane %v3052_v15, %v4512_v52  ;;  %v3069_v61 = vrot.slane %v3053_v63, %v4512_v52  ;;  %v3076_v6 = vrot.slane %v3054_v17, %v4512_v52 }
 0x193   : > { %v3083_v22 = vrot.slane %v3055_v40, %v4512_v52  ;;  %v1561_v23 = vrot.slane %v4844_v55, %v4279_v3  ;;  %v1565_v24 = vrot.slane %v4844_v55, %v4282_v4  ;;  %v1569_v26 = vrot.slane %v4844_v55, %v4493_v44 }
 0x194   : > { %v2953_v27 = vcombine.low %v2945_v7, %v2952_v21  ;;  %v3084_v28 = vcombine.low %v3062_v50, %v3069_v61  ;;  %v1573_v30 = vrot.slane %v4844_v55, %v4496_v46  ;;  %v1577_v31 = vrot.slane %v4844_v55, %v4499_v13 }
 0x195   : > { %v3085_v32 = vcombine.low %v3076_v6, %v3083_v22  ;;  %v1581_v33 = vrot.slane %v4844_v55, %v4502_v47  ;;  %v1585_v34 = vrot.slane %v4844_v55, %v4505_v48  ;;  %v3003_v56 = vcombine.low %v1557_v20, %v1561_v23 }
 0x196   : > { %3416 = vperm.xlu1 %3870, %v2953_v27   ;;  %v3092_v36 = vrot.slane %v3084_v28, %v4512_v52  ;;  %v3004_v37 = vcombine.low %v1565_v24, %v1569_v26  ;;  %v3005_v38 = vcombine.low %v1573_v30, %v1577_v31  ;;  %v1621_v29 = vrot.slane %v4894_v9, %v4276_v2 }
 0x197   : > { %v3099_v41 = vrot.slane %v3085_v32, %v4512_v52  ;;  %v3006_v51 = vcombine.low %v1581_v33, %v1585_v34  ;;  %v3013_v53 = vrot.slane %v3003_v56, %v4512_v52  ;;  %v1625_v12 = vrot.slane %v4894_v9, %v4279_v3 }
 0x198   : > { %v3020_v43 = vrot.slane %v3004_v37, %v4512_v52  ;;  %v3027_v55 = vrot.slane %v3005_v38, %v4512_v52  ;;  %v1629_v45 = vrot.slane %v4894_v9, %v4282_v4  ;;  %v1633_v49 = vrot.slane %v4894_v9, %v4493_v44 }
 0x199   : > { %v3100_v39 = vcombine.low %v3092_v36, %v3099_v41  ;;  %v3034_v57 = vrot.slane %v3006_v51, %v4512_v52  ;;  %v1637_v58 = vrot.slane %v4894_v9, %v4496_v46  ;;  %v1641_v60 = vrot.slane %v4894_v9, %v4499_v13 }
 0x19a   : > { %v3035_v62 = vcombine.low %v3013_v53, %v3020_v43  ;;  %v1645_v5 = vrot.slane %v4894_v9, %v4502_v47  ;;  %v1649_v10 = vrot.slane %v4894_v9, %v4505_v48  ;;  %v3101_v11 = vcombine.low %v1621_v29, %v1625_v12 }
 0x19b   : > { %3425 = vperm.xlu0 %3869, %v3100_v39   ;;  %v3036_v15 = vcombine.low %v3027_v55, %v3034_v57  ;;  %v3102_v63 = vcombine.low %v1629_v45, %v1633_v49  ;;  %v3103_v17 = vcombine.low %v1637_v58, %v1641_v60  ;;  %v5082_v7 = vadd.f32 %v4490_v42, %v687_v54 }
 0x19c   : > { %v3043_v40 = vrot.slane %v3035_v62, %v4512_v52  ;;  %v3104_v20 = vcombine.low %v1645_v5, %v1649_v10  ;;  %v3111_v21 = vrot.slane %v3101_v11, %v4512_v52  ;;  %v1109_v50 = vrot.slane %v4603_v35, %v4276_v2 }
 0x19d   : > { %v3050_v61 = vrot.slane %v3036_v15, %v4512_v52  ;;  %v3118_v9 = vrot.slane %v3102_v63, %v4512_v52  ;;  %v3125_v6 = vrot.slane %v3103_v17, %v4512_v52  ;;  %v1113_v22 = vrot.slane %v4603_v35, %v4279_v3 }
 0x19e   : > { %v3132_v42 = vrot.slane %v3104_v20, %v4512_v52  ;;  %v1117_v23 = vrot.slane %v4603_v35, %v4282_v4  ;;  %v1121_v24 = vrot.slane %v4603_v35, %v4493_v44  ;;  %v1125_v26 = vrot.slane %v4603_v35, %v4496_v46 }
 0x19f   : > { %v3051_v27 = vcombine.low %v3043_v40, %v3050_v61  ;;  %v3133_v28 = vcombine.low %v3111_v21, %v3118_v9  ;;  %v1129_v30 = vrot.slane %v4603_v35, %v4499_v13  ;;  %v1133_v31 = vrot.slane %v4603_v35, %v4502_v47 }
 0x1a0   : > { %v3134_v32 = vcombine.low %v3125_v6, %v3132_v42  ;;  %v1137_v33 = vrot.slane %v4603_v35, %v4505_v48  ;;  %v2317_v34 = vcombine.low %v1109_v50, %v1113_v22  ;;  %v2318_v56 = vcombine.low %v1117_v23, %v1121_v24 }
 0x1a1   : > { %3422 = vperm.xlu1 %3870, %v3051_v27   ;;  %v3141_v36 = vrot.slane %v3133_v28, %v4512_v52  ;;  %v2319_v37 = vcombine.low %v1125_v26, %v1129_v30  ;;  %v1653_v38 = vrot.slane %v4942_v16, %v4276_v2  ;;  %v1657_v29 = vrot.slane %v4942_v16, %v4279_v3 }
 0x1a2   : > { %v3148_v41 = vrot.slane %v3134_v32, %v4512_v52  ;;  %v2320_v51 = vcombine.low %v1133_v31, %v1137_v33  ;;  %v2327_v53 = vrot.slane %v2317_v34, %v4512_v52  ;;  %v2334_v12 = vrot.slane %v2318_v56, %v4512_v52 }
 0x1a3   : > { %v2341_v35 = vrot.slane %v2319_v37, %v4512_v52  ;;  %v1661_v43 = vrot.slane %v4942_v16, %v4282_v4  ;;  %v1665_v55 = vrot.slane %v4942_v16, %v4493_v44  ;;  %v1669_v45 = vrot.slane %v4942_v16, %v4496_v46 }
 0x1a4   : > { %v3149_v49 = vcombine.low %v3141_v36, %v3148_v41  ;;  %v2348_v54 = vrot.slane %v2320_v51, %v4512_v52  ;;  %v2349_v39 = vcombine.low %v2327_v53, %v2334_v12  ;;  %v1673_v57 = vrot.slane %v4942_v16, %v4499_v13 }
 0x1a5   : > { %v1677_v58 = vrot.slane %v4942_v16, %v4502_v47  ;;  %v1681_v60 = vrot.slane %v4942_v16, %v4505_v48  ;;  %v3150_v62 = vcombine.low %v1653_v38, %v1657_v29  ;;  %v3151_v5 = vcombine.low %v1661_v43, %v1665_v55 }
 0x1a6   : > { %3428 = vperm.xlu0 %3869, %v3149_v49   ;;  %v2350_v10 = vcombine.low %v2341_v35, %v2348_v54  ;;  %v2357_v11 = vrot.slane %v2349_v39, %v4512_v52  ;;  %v3152_v15 = vcombine.low %v1669_v45, %v1673_v57  ;;  %v1141_v63 = vrot.slane %v4616_v8, %v4276_v2 }
 0x1a7   : > { %v3153_v17 = vcombine.low %v1677_v58, %v1681_v60  ;;  %v3160_v40 = vrot.slane %v3150_v62, %v4512_v52  ;;  %v3167_v20 = vrot.slane %v3151_v5, %v4512_v52  ;;  %v1145_v21 = vrot.slane %v4616_v8, %v4279_v3 }
 0x1a8   : > { %v2364_v16 = vrot.slane %v2350_v10, %v4512_v52  ;;  %v3174_v50 = vrot.slane %v3152_v15, %v4512_v52  ;;  %v1149_v61 = vrot.slane %v4616_v8, %v4282_v4  ;;  %v1153_v9 = vrot.slane %v4616_v8, %v4493_v44 }
 0x1a9   : > { %v3181_v6 = vrot.slane %v3153_v17, %v4512_v52  ;;  %v3182_v22 = vcombine.low %v3160_v40, %v3167_v20  ;;  %v1157_v42 = vrot.slane %v4616_v8, %v4496_v46  ;;  %v1161_v23 = vrot.slane %v4616_v8, %v4499_v13 }
 0x1aa   : > { %v2365_v24 = vcombine.low %v2357_v11, %v2364_v16  ;;  %v1165_v26 = vrot.slane %v4616_v8, %v4502_v47  ;;  %v1169_v27 = vrot.slane %v4616_v8, %v4505_v48  ;;  %v2366_v28 = vcombine.low %v1141_v63, %v1145_v21 }
 0x1ab   : > { %v3183_v30 = vcombine.low %v3174_v50, %v3181_v6  ;;  %v3190_v31 = vrot.slane %v3182_v22, %v4512_v52  ;;  %v2367_v32 = vcombine.low %v1149_v61, %v1153_v9  ;;  %v2368_v33 = vcombine.low %v1157_v42, %v1161_v23 }
 0x1ac   : > { %3380 = vperm.xlu1 %3870, %v2365_v24   ;;  %v2369_v34 = vcombine.low %v1165_v26, %v1169_v27  ;;  %v2376_v56 = vrot.slane %v2366_v28, %v4512_v52  ;;  %v1685_v36 = vrot.slane %v4989_v18, %v4276_v2  ;;  %v1689_v37 = vrot.slane %v4989_v18, %v4279_v3 }
 0x1ad   : > { %v3197_v38 = vrot.slane %v3183_v30, %v4512_v52  ;;  %v2383_v8 = vrot.slane %v2367_v32, %v4512_v52  ;;  %v2390_v29 = vrot.slane %v2368_v33, %v4512_v52  ;;  %v1693_v41 = vrot.slane %v4989_v18, %v4282_v4 }
 0x1ae   : > { %v2397_v51 = vrot.slane %v2369_v34, %v4512_v52  ;;  %v1697_v53 = vrot.slane %v4989_v18, %v4493_v44  ;;  %v1701_v12 = vrot.slane %v4989_v18, %v4496_v46  ;;  %v1705_v35 = vrot.slane %v4989_v18, %v4499_v13 }
 0x1af   : > { %v3198_v43 = vcombine.low %v3190_v31, %v3197_v38  ;;  %v2398_v55 = vcombine.low %v2376_v56, %v2383_v8  ;;  %v1709_v45 = vrot.slane %v4989_v18, %v4502_v47  ;;  %v1713_v49 = vrot.slane %v4989_v18, %v4505_v48 }
 0x1b0   : > { %v2399_v54 = vcombine.low %v2390_v29, %v2397_v51  ;;  %v3199_v39 = vcombine.low %v1685_v36, %v1689_v37  ;;  %v3200_v57 = vcombine.low %v1693_v41, %v1697_v53  ;;  %v3201_v58 = vcombine.low %v1701_v12, %v1705_v35 }
 0x1b1   : > { %3431 = vperm.xlu0 %3869, %v3198_v43   ;;  %v2406_v60 = vrot.slane %v2398_v55, %v4512_v52  ;;  %v3202_v62 = vcombine.low %v1709_v45, %v1713_v49  ;;  %v1173_v5 = vrot.slane %v4622_v59, %v4276_v2  ;;  %v1177_v10 = vrot.slane %v4622_v59, %v4279_v3 }
 0x1b2   : > { %v2413_v11 = vrot.slane %v2399_v54, %v4512_v52  ;;  %v3209_v15 = vrot.slane %v3199_v39, %v4512_v52  ;;  %v3216_v18 = vrot.slane %v3200_v57, %v4512_v52  ;;  %v3223_v63 = vrot.slane %v3201_v58, %v4512_v52 }
 0x1b3   : > { %v3230_v17 = vrot.slane %v3202_v62, %v4512_v52  ;;  %v1181_v40 = vrot.slane %v4622_v59, %v4282_v4  ;;  %v1185_v20 = vrot.slane %v4622_v59, %v4493_v44  ;;  %v1189_v21 = vrot.slane %v4622_v59, %v4496_v46 }
 0x1b4   : > { %v2414_v16 = vcombine.low %v2406_v60, %v2413_v11  ;;  %v3231_v50 = vcombine.low %v3209_v15, %v3216_v18  ;;  %v1193_v61 = vrot.slane %v4622_v59, %v4499_v13  ;;  %v1197_v9 = vrot.slane %v4622_v59, %v4502_v47 }
 0x1b5   : > { %v3232_v6 = vcombine.low %v3223_v63, %v3230_v17  ;;  %v1201_v22 = vrot.slane %v4622_v59, %v4505_v48  ;;  %v2415_v42 = vcombine.low %v1173_v5, %v1177_v10  ;;  %v2416_v23 = vcombine.low %v1181_v40, %v1185_v20 }
 0x1b6   : > { %3383 = vperm.xlu1 %3870, %v2414_v16   ;;  %v3239_v24 = vrot.slane %v3231_v50, %v4512_v52  ;;  %v2417_v26 = vcombine.low %v1189_v21, %v1193_v61  ;;  %v1717_v27 = vrot.slane %v5036_v19, %v4276_v2  ;;  %v1721_v28 = vrot.slane %v5036_v19, %v4279_v3 }
 0x1b7   : > { %v3246_v30 = vrot.slane %v3232_v6, %v4512_v52  ;;  %v2418_v31 = vcombine.low %v1197_v9, %v1201_v22  ;;  %v2425_v32 = vrot.slane %v2415_v42, %v4512_v52  ;;  %v2432_v33 = vrot.slane %v2416_v23, %v4512_v52 }
 0x1b8   : > { %v2439_v59 = vrot.slane %v2417_v26, %v4512_v52  ;;  %v1725_v34 = vrot.slane %v5036_v19, %v4282_v4  ;;  %v1729_v56 = vrot.slane %v5036_v19, %v4493_v44  ;;  %v1733_v36 = vrot.slane %v5036_v19, %v4496_v46 }
 0x1b9   : > { %v3247_v37 = vcombine.low %v3239_v24, %v3246_v30  ;;  %v2446_v38 = vrot.slane %v2418_v31, %v4512_v52  ;;  %v2447_v8 = vcombine.low %v2425_v32, %v2432_v33  ;;  %v1737_v29 = vrot.slane %v5036_v19, %v4499_v13 }
 0x1ba   : > { %v1741_v41 = vrot.slane %v5036_v19, %v4502_v47  ;;  %v1745_v51 = vrot.slane %v5036_v19, %v4505_v48  ;;  %v3248_v53 = vcombine.low %v1717_v27, %v1721_v28  ;;  %v3249_v12 = vcombine.low %v1725_v34, %v1729_v56 }
 0x1bb   : > { %3434 = vperm.xlu0 %3869, %v3247_v37   ;;  %v2448_v35 = vcombine.low %v2439_v59, %v2446_v38  ;;  %v2455_v43 = vrot.slane %v2447_v8, %v4512_v52  ;;  %v3250_v55 = vcombine.low %v1733_v36, %v1737_v29  ;;  %v1205_v45 = vrot.slane %v4638_v14, %v4276_v2 }
 0x1bc   : > { %v3251_v49 = vcombine.low %v1741_v41, %v1745_v51  ;;  %v3258_v54 = vrot.slane %v3248_v53, %v4512_v52  ;;  %v3265_v39 = vrot.slane %v3249_v12, %v4512_v52  ;;  %v1209_v57 = vrot.slane %v4638_v14, %v4279_v3 }
 0x1bd   : > { %v2462_v19 = vrot.slane %v2448_v35, %v4512_v52  ;;  %v3272_v58 = vrot.slane %v3250_v55, %v4512_v52  ;;  %v1213_v60 = vrot.slane %v4638_v14, %v4282_v4  ;;  %v1217_v62 = vrot.slane %v4638_v14, %v4493_v44 }
 0x1be   : > { %v3279_v5 = vrot.slane %v3251_v49, %v4512_v52  ;;  %v3280_v10 = vcombine.low %v3258_v54, %v3265_v39  ;;  %v1221_v11 = vrot.slane %v4638_v14, %v4496_v46  ;;  %v1225_v15 = vrot.slane %v4638_v14, %v4499_v13 }
 0x1bf   : > { %v2463_v18 = vcombine.low %v2455_v43, %v2462_v19  ;;  %v1229_v63 = vrot.slane %v4638_v14, %v4502_v47  ;;  %v1233_v17 = vrot.slane %v4638_v14, %v4505_v48  ;;  %v2464_v40 = vcombine.low %v1205_v45, %v1209_v57 }
 0x1c0   : > { %v3281_v20 = vcombine.low %v3272_v58, %v3279_v5  ;;  %v3288_v21 = vrot.slane %v3280_v10, %v4512_v52  ;;  %v2465_v16 = vcombine.low %v1213_v60, %v1217_v62  ;;  %v2466_v50 = vcombine.low %v1221_v11, %v1225_v15 }
 0x1c1   : > { %3386 = vperm.xlu1 %3870, %v2463_v18   ;;  %v2467_v61 = vcombine.low %v1229_v63, %v1233_v17  ;;  %v2474_v9 = vrot.slane %v2464_v40, %v4512_v52  ;;  %v1749_v6 = vrot.slane %v5082_v7, %v4276_v2  ;;  %v1753_v22 = vrot.slane %v5082_v7, %v4279_v3  ;;  %v5290_v63 = vpop.permute.xlu1 %3350 }
 0x1c2   : > { %v3295_v42 = vrot.slane %v3281_v20, %v4512_v52  ;;  %v2481_v14 = vrot.slane %v2465_v16, %v4512_v52  ;;  %v2488_v23 = vrot.slane %v2466_v50, %v4512_v52  ;;  %v1757_v24 = vrot.slane %v5082_v7, %v4282_v4  ;;  %v3348_v50 = vpop.permute.xlu0 %3347 }
 0x1c3   : > { %v2495_v26 = vrot.slane %v2467_v61, %v4512_v52  ;;  %v1761_v27 = vrot.slane %v5082_v7, %v4493_v44  ;;  %v1765_v28 = vrot.slane %v5082_v7, %v4496_v46  ;;  %v1769_v30 = vrot.slane %v5082_v7, %v4499_v13 }
 0x1c4   : > { %v3296_v31 = vcombine.low %v3288_v21, %v3295_v42  ;;  %v2496_v32 = vcombine.low %v2474_v9, %v2481_v14  ;;  %v1773_v33 = vrot.slane %v5082_v7, %v4502_v47  ;;  %v1777_v59 = vrot.slane %v5082_v7, %v4505_v48 }
 0x1c5   : > { %v2497_v34 = vcombine.low %v2488_v23, %v2495_v26  ;;  %v3297_v56 = vcombine.low %v1749_v6, %v1753_v22  ;;  %v3298_v36 = vcombine.low %v1757_v24, %v1761_v27  ;;  %v3299_v37 = vcombine.low %v1765_v28, %v1769_v30  ;;  %v5292_v17 = vpop.permute.xlu1 %3353 }
 0x1c6   : > { %3437 = vperm.xlu0 %3869, %v3296_v31   ;;  %v2504_v38 = vrot.slane %v2496_v32, %v4512_v52  ;;  %v3300_v8 = vcombine.low %v1773_v33, %v1777_v59  ;;  %v1237_v29 = vrot.slane %v4644_v25, %v4276_v2  ;;  %v1241_v41 = vrot.slane %v4644_v25, %v4279_v3 }
 0x1c7   : > { %v2511_v51 = vrot.slane %v2497_v34, %v4512_v52  ;;  %v3307_v53 = vrot.slane %v3297_v56, %v4512_v52  ;;  %v3314_v7 = vrot.slane %v3298_v36, %v4512_v52  ;;  %v3321_v12 = vrot.slane %v3299_v37, %v4512_v52 }
 0x1c8   : > { %v3328_v35 = vrot.slane %v3300_v8, %v4512_v52  ;;  %v1245_v43 = vrot.slane %v4644_v25, %v4282_v4  ;;  %v1249_v55 = vrot.slane %v4644_v25, %v4493_v44  ;;  %v1253_v2 = vrot.slane %v4644_v25, %v4496_v46 }
 0x1c9   : > { %v2512_v3 = vcombine.low %v2504_v38, %v2511_v51  ;;  %v3329_v45 = vcombine.low %v3307_v53, %v3314_v7  ;;  %v1257_v49 = vrot.slane %v4644_v25, %v4499_v13  ;;  %v1261_v54 = vrot.slane %v4644_v25, %v4502_v47  ;;  %v5294_v40 = vpop.permute.xlu1 %3356 }
 0x1ca   : > { %v3330_v39 = vcombine.low %v3321_v12, %v3328_v35  ;;  %v1265_v57 = vrot.slane %v4644_v25, %v4505_v48  ;;  %v2513_v19 = vcombine.low %v1237_v29, %v1241_v41  ;;  %v2514_v4 = vcombine.low %v1245_v43, %v1249_v55  ;;  %v5304_v9 = vpop.permute.xlu0 %3374 }
 0x1cb   : > { %3389 = vperm.xlu1 %3870, %v2512_v3   ;;  %v3337_v44 = vrot.slane %v3329_v45, %v4512_v52  ;;  %v2515_v58 = vcombine.low %v1253_v2, %v1257_v49  ;;  %v5313_v31 = vand.u32 127, %v452_v0 }
 0x1cc   : > { %v3344_v46 = vrot.slane %v3330_v39, %v4512_v52  ;;  %v2516_v60 = vcombine.low %v1261_v54, %v1265_v57  ;;  %v2523_v62 = vrot.slane %v2513_v19, %v4512_v52  ;;  %v2530_v13 = vrot.slane %v2514_v4, %v4512_v52 }
 0x1cd   : > { %v2537_v5 = vrot.slane %v2515_v58, %v4512_v52  ;;  %v5296_v20 = vpop.permute.xlu1 %3359  ;;  %v3448_v33 = vadd.s32 4294967288, %v5313_v31  ;;  %v3462_v56 = vadd.s32 4294967272, %v5313_v31  ;;  %v3455_v36 = vadd.s32 4294967280, %v5313_v31 }
 0x1ce   : > { %v3345_v47 = vcombine.low %v3337_v44, %v3344_v46  ;;  %v2544_v10 = vrot.slane %v2516_v60, %v4512_v52  ;;  %v2545_v11 = vcombine.low %v2523_v62, %v2530_v13  ;;  %v3446_v38 = vsub.s32 %v5313_v31, %v4273_v1 }
 0x1cf   : > { %v3451_v34 = vsub.s32 %v3448_v33, %v4273_v1  ;;  %v3465_v41 = vsub.s32 %v3462_v56, %v4273_v1  ;;  %v3476_v51 = vadd.s32 4294967256, %v5313_v31  ;;  %v3458_v7 = vsub.s32 %v3455_v36, %v4273_v1 }
 0x1d0   : > { %3440 = vperm.xlu0 %3869, %v3345_v47   ;;  %v2546_v48 = vcombine.low %v2537_v5, %v2544_v10  ;;  %v2553_v25 = vrot.slane %v2545_v11, %v4512_v52  ;;  %v3469_v12 = vadd.s32 4294967264, %v5313_v31  ;;  %v3490_v45 = vadd.s32 4294967240, %v5313_v31 }
 0x1d1   : > { %v5298_v21 = vpop.permute.xlu1 %3362  ;;  %v3479_v3 = vsub.s32 %v3476_v51, %v4273_v1  ;;  %v3483_v54 = vadd.s32 4294967248, %v5313_v31  ;;  %v3452_v19 = vrot.slane %v5290_v63, %v3451_v34  ;;  %v3447_v58 = vrot.slane %v3348_v50, %v3446_v38 }
 0x1d2   : > { %v2560_v15 = vrot.slane %v2546_v48, %v4512_v52  ;;  %v3472_v49 = vsub.s32 %v3469_v12, %v4273_v1  ;;  %v3459_v46 = vrot.slane %v5292_v17, %v3458_v7  ;;  %v3466_v62 = vrot.slane %v5294_v40, %v3465_v41 }
 0x1d3   : > { %v3504_v13 = vadd.s32 4294967224, %v5313_v31  ;;  %v3493_v5 = vsub.s32 %v3490_v45, %v4273_v1  ;;  %v3486_v47 = vsub.s32 %v3483_v54, %v4273_v1  ;;  %v3497_v10 = vadd.s32 4294967232, %v5313_v31 }
 0x1d4   : > { %v2561_v18 = vcombine.low %v2553_v25, %v2560_v15  ;;  %v3454_v25 = vsel %vm3453_vm0, %v3452_v19, %v3447_v58  ;;  %v3473_v17 = vrot.slane %v5296_v20, %v3472_v49  ;;  %v3525_v36 = vadd.s32 4294967200, %v5313_v31 }
 0x1d5   : > { %v5300_v16 = vpop.permute.xlu1 %3365  ;;  %v3461_v63 = vsel %vm3460_vm1, %v3459_v46, %v3454_v25 }
 0x1d6   : > { %3392 = vperm.xlu1 %3870, %v2561_v18  }
 0x1d9   : > { %v5302_v61 = vpop.permute.xlu1 %3368 }
 0x1dd   : > { %v5306_v6 = vpop.permute.xlu1 %3371 }
 0x1e0   : > { %v3396_v22 = vpop.permute.xlu0 %3395 }
 0x1e1   : > { %v3556_v53 = vrot.slane %v3396_v22, %v3446_v38  ;;  %v3468_v22 = vsel %vm3467_vm2, %v3466_v62, %v3461_v63 }
 0x1e2   : > { %v3475_v33 = vsel %vm3474_vm3, %v3473_v17, %v3468_v22 }
 0x1e6   : > { %v5308_v42 = vpop.permute.xlu1 %3377 }
 0x1eb   : > { %v3402_v14 = vpop.permute.xlu0 %3401 }
 0x1ec   : > { %v3565_v55 = vrot.slane %v3402_v14, %v3458_v7  ;;  %v3507_v14 = vsub.s32 %v3504_v13, %v4273_v1 }
 0x1ee   : > { %v3508_v19 = vrot.slane %v5304_v9, %v3507_v14 }
 0x1f1   : > { %v3399_v23 = vpop.permute.xlu1 %3398 }
 0x1f2   : > { %v3560_v8 = vrot.slane %v3399_v23, %v3451_v34  ;;  %v3500_v23 = vsub.s32 %v3497_v10, %v4273_v1  ;;  %v3487_v34 = vrot.slane %v5300_v16, %v3486_v47 }
 0x1f4   : > { %v3561_v35 = vsel %vm3453_vm0, %v3560_v8, %v3556_v53  ;;  %v3494_v8 = vrot.slane %v5302_v61, %v3493_v5  ;;  %v3539_v53 = vadd.s32 4294967184, %v5313_v31  ;;  %v3546_v61 = vadd.s32 4294967176, %v5313_v31 }
 0x1f5   : > { %v3566_v39 = vsel %vm3460_vm1, %v3565_v55, %v3561_v35 }
 0x1f6   : > { %v3408_v24 = vpop.permute.xlu0 %3407 }
 0x1f7   : > { %v3575_v60 = vrot.slane %v3408_v24, %v3472_v49  ;;  %v3511_v24 = vadd.s32 4294967216, %v5313_v31 }
 0x1fc   : > { %v3405_v26 = vpop.permute.xlu1 %3404 }
 0x1fd   : > { %v3570_v43 = vrot.slane %v3405_v26, %v3465_v41  ;;  %v3501_v41 = vrot.slane %v5306_v6, %v3500_v23  ;;  %v3528_v6 = vsub.s32 %v3525_v36, %v4273_v1 }
 0x1ff   : > { %v3571_v4 = vsel %vm3467_vm2, %v3570_v43, %v3566_v39 }
 0x200   : > { %v3576_v11 = vsel %vm3474_vm3, %v3575_v60, %v3571_v4 }
 0x201   : > { %v3414_v27 = vpop.permute.xlu0 %3413 }
 0x202   : > { %v3585_v40 = vrot.slane %v3414_v27, %v3486_v47  ;;  %v3518_v27 = vadd.s32 4294967208, %v5313_v31 }
 0x204   : > { %v3521_v12 = vsub.s32 %v3518_v27, %v4273_v1 }
 0x206   : > { %v3411_v28 = vpop.permute.xlu1 %3410 }
 0x207   : > { %v3580_v44 = vrot.slane %v3411_v28, %v3479_v3  ;;  %v3480_v28 = vrot.slane %v5298_v21, %v3479_v3  ;;  %v3532_v21 = vadd.s32 4294967192, %v5313_v31  ;;  %v3542_v31 = vsub.s32 %v3539_v53, %v4273_v1 }
 0x209   : > { %v3581_v15 = vsel %vm3481_vm4, %v3580_v44, %v3576_v11  ;;  %v3535_v3 = vsub.s32 %v3532_v21, %v4273_v1  ;;  %v3549_v44 = vsub.s32 %v3546_v61, %v4273_v1 }
 0x20a   : > { %v3586_v26 = vsel %vm3488_vm5, %v3585_v40, %v3581_v15 }
 0x20c   : > { %v5310_v30 = vpop.permute.xlu0 %3419 }
 0x20d   : > { %v3595_v56 = vrot.slane %v5310_v30, %v3500_v23  ;;  %v3482_v30 = vsel %vm3481_vm4, %v3480_v28, %v3475_v33 }
 0x20e   : > { %v3489_v35 = vsel %vm3488_vm5, %v3487_v34, %v3482_v30 }
 0x20f   : > { %v3496_v55 = vsel %vm3495_vm6, %v3494_v8, %v3489_v35 }
 0x210   : > { %v3503_v45 = vsel %vm3502_vm7, %v3501_v41, %v3496_v55 }
 0x211   : > { %v3417_v32 = vpop.permute.xlu1 %3416  ;;  %v3510_v60 = vsel %vm3509_vm8, %v3508_v19, %v3503_v45 }
 0x212   : > { %v3590_v18 = vrot.slane %v3417_v32, %v3493_v5 }
 0x214   : > { %v3591_v32 = vsel %vm3495_vm6, %v3590_v18, %v3586_v26 }
 0x215   : > { %v3596_v51 = vsel %vm3502_vm7, %v3595_v56, %v3591_v32 }
 0x216   : > { %v5316_v59 = vpop.permute.xlu0 %3425 }
 0x21c   : > { %v5321_v37 = vpop.permute.xlu1 %3422 }
 0x21d   : > { %v3600_v20 = vrot.slane %v5321_v37, %v3507_v14  ;;  %v3514_v37 = vsub.s32 %v3511_v24, %v4273_v1 }
 0x21f   : > { %v3601_v7 = vsel %vm3509_vm8, %v3600_v20, %v3596_v51  ;;  %v3605_v43 = vrot.slane %v5316_v59, %v3514_v37  ;;  %v3515_v49 = vrot.slane %v5308_v42, %v3514_v37 }
 0x221   : > { %v5325_v29 = vpop.permute.xlu0 %3428  ;;  %v3606_v54 = vsel %vm3516_vm9, %v3605_v43, %v3601_v7 }
 0x222   : > { %v3610_v59 = vrot.slane %v5325_v29, %v3521_v12  ;;  %v3517_v29 = vsel %vm3516_vm9, %v3515_v49, %v3510_v60 }
 0x224   : > { %v3611_v62 = vsel %vm3523_vm10, %v3610_v59, %v3606_v54 }
 0x227   : > { %v5332_v2 = vpop.permute.xlu1 %3380 }
 0x228   : > { %v3522_v4 = vrot.slane %v5332_v2, %v3521_v12 }
 0x22a   : > { %v3524_v1 = vsel %vm3523_vm10, %v3522_v4, %v3517_v29 }
 0x22c   : > { %v5339_v57 = vpop.permute.xlu0 %3431 }
 0x22d   : > { %v3615_v58 = vrot.slane %v5339_v57, %v3528_v6 }
 0x22f   : > { %v3616_v47 = vsel %vm3530_vm11, %v3615_v58, %v3611_v62 }
 0x231   : > { %v5350_v48 = vpop.permute.xlu1 %3383 }
 0x232   : > { %v3529_v46 = vrot.slane %v5350_v48, %v3528_v6 }
 0x234   : > { %v3531_v10 = vsel %vm3530_vm11, %v3529_v46, %v3524_v1 }
 0x236   : > { %v5356_v50 = vpop.permute.xlu0 %3434 }
 0x237   : > { %v3620_v13 = vrot.slane %v5356_v50, %v3535_v3 }
 0x239   : > { %v3621_v48 = vsel %vm3537_vm12, %v3620_v13, %v3616_v47 }
 0x23c   : > { %v3387_v38 = vpop.permute.xlu1 %3386 }
 0x23d   : > { %v3536_v9 = vrot.slane %v3387_v38, %v3535_v3 }
 0x23f   : > { %v3538_v25 = vsel %vm3537_vm12, %v3536_v9, %v3531_v10 }
 0x241   : > { %v3438_v16 = vpop.permute.xlu0 %3437 }
 0x242   : > { %v3625_v2 = vrot.slane %v3438_v16, %v3542_v31 }
 0x244   : > { %v3626_v18 = vsel %vm3544_vm13, %v3625_v2, %v3621_v48 }
 0x246   : > { %v3390_v39 = vpop.permute.xlu1 %3389 }
 0x247   : > { %v3543_v5 = vrot.slane %v3390_v39, %v3542_v31 }
 0x249   : > { %v3545_v63 = vsel %vm3544_vm13, %v3543_v5, %v3538_v25 }
 0x24b   : > { %v3441_v42 = vpop.permute.xlu0 %3440 }
 0x24c   : > { %v3630_v57 = vrot.slane %v3441_v42, %v3549_v44 }
 0x24e   : > { %v3631_v17 = vsel %vm3551_vm14, %v3630_v57, %v3626_v18 }
 0x251   : > { %v3393_v11 = vpop.permute.xlu1 %3392 }
 0x252   : > { %v3550_v15 = vrot.slane %v3393_v11, %v3549_v44 }
 0x254   : > { %v3552_v40 = vsel %vm3551_vm14, %v3550_v15, %v3545_v63 }
 0x255   : > { %v3632_v50 = vcombine.low %v3552_v40, %v3631_v17 }
 0x257   : > { %v3639_v22 = vrot.slane %v3632_v50, %v4512_v52 }
 0x259   : > { %v3646_v14 = vrot.slane %v3639_v22, %v4512_v52 }
 0x25b   : > { %3652 = vst.msk [vmem:[%s338_s13] sm:$0x3] %vm3650_vm15, %v3646_v14 }
 0x25c   : > { %3962 = shalt.err (!%p3959_p7)
}
 0x25d   : > { %s3963_s18 = scalar_lea.hbm %s3666_s26, 32  ;;  %s3967_s19 = scalar_lea.hbm %s5446_s5, 128 }
 0x25e   : > { %p3964_p4 = scmp.ne.s32.totalorder %s3666_s26, %s3963_s18  ;;  %p3968_p11 = scmp.lt.s32.totalorder %s3666_s26, %s5446_s5 }
 0x25f   : > { %p3969_p12 = scmp.lt.s32.totalorder %s3967_s19, %s3963_s18 }
 0x260   : > { %p3965_p10 = pnand %p3964_p4, %p5452_p5 }
 0x261   : > { %p3970_p0 = por %p3969_p12, %p3968_p11 }
 0x262   : > { %p3966_p8 = pneg %p3965_p10 }
 0x264   : > { %p3971_p6 = pnand %p3970_p0, %p3966_p8 }
 0x266   : > { %3974 = shalt.err (!%p3971_p6)
}
 0x267   : > { %3822 = dma.vmem_to_hbm [thread:$0]  (%p5452_p5), %s3669_s29, 32, %s3666_s26, %s3654_s27  }
 0x268 PF: > { %p3828_p1 = scmp.ge.s32.totalorder %s4017_s23, 2  ;;  %s3680_s11 = sand.u32 1, %s4005_s20  }
 0x269   : > { %p5453_p3 = scmp.ne.s32.totalorder %s5451_s7, 0  ;;  %s3681_s12 = scalar_lea.sflag [#allocation5], %s3680_s11 }
 0x26b   : > { %p3825_p9 = pnand %p3828_p1, %p5453_p3 }
 0x26d   : > { %p3826_p13 = pneg %p3825_p9 }
 0x26f   : > { %4000 = dma.done.wait (%p3826_p13), %s3681_s12, 32  }
 0x270   : > { %4002 = vsyncadd (%p3826_p13), %s3681_s12, 4294967264  ;;  %p22_p2 = scmp.ge.s32.totalorder %s4089_s25, 6   ;;  %s5454_s20 = smov %s4009_s21 }
 0x271   : > { %s5455_s21 = smov %s4013_s22  ;;  %s5456_s22 = smov %s4101_s28 }
 0x272   : > { %s5457_s23 = smov %s4089_s25  ;;  %24 = sbr.rel (!%p22_p2) target bundleno = 9 (0x9), region = 109 }
 0x277   :  { %3686 = vsyncpa [#allocation4], 1 }
 0x278   :  { %3688 = vsyncpa [#allocation4 + $0x1], 1 }
 0x279   :  { %3689 = vsyncpa [#allocation7], 1 }
 0x27a   :  { %3691 = vsyncpa [#allocation7 + $0x1], 1 }
 0x27b   :  { %3692 = vsyncpa [#allocation5], 1 }
 0x27c   :  { %3694 = vsyncpa [#allocation5 + $0x1], 1 }

</bundles_post_ra>
